<compile_context>
chip_gen: v5e
topology: v5e:2x2
jax: 0.10.0
libtpu: 0.0.40
codegen_flags: <defaults>
</compile_context>

<pallas_src>
import functools

import jax
import jax.numpy as jnp
import numpy as np
from jax.experimental import pallas as pl
from jax.experimental.pallas import tpu as pltpu

EPS = 1e-5          # nn.InstanceNorm2d default
LRELU_SLOPE = 0.2   # Conv2dLayer uses nn.LeakyReLU(0.2)


def _seg_in_lrelu(y, segm, segT):
    """Per-image InstanceNorm (affine=False, biased var) + LeakyReLU(0.2), fused.

    y:    (P, Lb) -- each image is a contiguous HW-lane segment of the slab.
    segm: (Lb, Bt) segment-mean matrix (one-hot / HW).
    segT: (Bt, Lb) one-hot broadcast-back matrix.

    Two matmuls total: [y ; y*y] @ segm -> (mu, m2) and [rstd ; -mu*rstd] @ segT ->
    (a, b); then y_norm = y*a + b.  var = E[y^2] - mu^2 (single pass).
    """
    P = y.shape[0]
    stacked = jnp.concatenate([y, y * y], axis=0)                     # (2P, Lb)
    stats = jnp.dot(stacked, segm, preferred_element_type=jnp.float32)  # (2P, Bt)
    mu = stats[:P]
    m2 = stats[P:]
    var = jnp.maximum(m2 - mu * mu, 0.0)
    rstd = jax.lax.rsqrt(var + EPS)
    ab = jnp.concatenate([rstd, -mu * rstd], axis=0)                  # (2P, Bt)
    ab_b = jnp.dot(ab, segT, preferred_element_type=jnp.float32)      # (2P, Lb)
    y = y * ab_b[:P] + ab_b[P:]
    return jnp.where(y >= 0, y, LRELU_SLOPE * y)


def basic_block_in_kernel(x_ref, w1_ref, w2_ref, mask_ref, segm_ref, segT_ref,
                          o_ref, taps_ref, *, W):
    # x_ref   : (C, Bt*HW)   Bt images, channels on sublanes, pixels on lanes
    # w1_ref  : (P, C)       1x1 conv weight (f32)
    # w2_ref  : (P, 9*P)     3x3 conv weight (taps dtype), contraction idx = tap*P + cin
    # mask_ref: (9, Bt*HW)   per-tap zero-padding validity masks (0/1, f32)
    # segm_ref: (Bt*HW, Bt)  per-image mean matrix (one-hot / HW)
    # segT_ref: (Bt, Bt*HW)  per-image broadcast-back matrix (one-hot)
    # o_ref   : (P, Bt*HW)
    # taps_ref: (9*P, Bt*HW) VMEM scratch for the stacked conv2 taps (bf16 by default)
    P = w1_ref.shape[0]
    Lb = x_ref.shape[-1]
    taps_dtype = taps_ref.dtype

    segm = segm_ref[...]
    segT = segT_ref[...]

    # ---- conv1: 1x1 conv == one channel matmul over the whole lane slab ----
    # (bias omitted: cancelled exactly by the affine=False InstanceNorm)
    y1 = jnp.dot(w1_ref[...], x_ref[...].astype(jnp.float32),
                 preferred_element_type=jnp.float32)                  # (P, Lb)
    y1 = _seg_in_lrelu(y1, segm, segT)

    # ---- conv2: 3x3 conv (pad=1) as ONE stacked K=9*P matmul ----
    # Each tap is a single combined roll of y1 (rolls wrap across image boundaries /
    # slab ends, but every wrapped/out-of-image tap is killed by the validity mask).
    for k in range(9):
        dy, dx = k // 3 - 1, k % 3 - 1
        if dy == 0 and dx == 0:
            tap = y1                                   # center tap: no roll, no mask
        else:
            tap = pltpu.roll(y1, (-(dy * W + dx)) % Lb, 1)
            tap = tap * mask_ref[pl.ds(k, 1), :]       # (1, Lb) broadcast over sublanes
        taps_ref[pl.ds(k * P, P), :] = tap.astype(taps_dtype)

    y2 = jnp.dot(w2_ref[...], taps_ref[...], preferred_element_type=jnp.float32)
    y2 = _seg_in_lrelu(y2, segm, segT)                                # (P, Lb)

    # ---- residual add + ReLU (re-read x_ref to keep its live range short) ----
    o_ref[...] = jnp.maximum(y2 + x_ref[...].astype(jnp.float32), 0.0).astype(o_ref.dtype)


def _pick_bt(n, max_bt=8, min_grid_steps=2):
    """Largest divisor of n that is <= max_bt while keeping >= min_grid_steps grid
    steps (min_grid_steps=2 keeps both v7x TensorCores fed; pass 1 on single-TC
    v5e/v6e to get a single larger lane slab)."""
    if n <= 1:
        return max(n, 1)
    limit = max(1, min(max_bt, n // max(min_grid_steps, 1)))
    for bt in range(limit, 0, -1):
        if n % bt == 0:
            return bt
    return 1


def _vmem_limit_bytes(C, P, Lb, bt, taps_itemsize):
    """Rough per-step VMEM budget (double-buffered pipeline blocks + scratch)."""
    f32 = 4
    db = 2
    pad8 = lambda v: -(-v // 8) * 8
    pad128 = lambda v: -(-v // 128) * 128
    need = (
        db * C * Lb * f32                              # x blocks
        + db * P * Lb * f32                            # out blocks
        + db * pad8(P) * pad128(C) * f32               # w1
        + db * pad8(P) * pad128(9 * P) * taps_itemsize  # w2
        + db * pad8(9) * Lb * f32                      # masks
        + db * Lb * pad128(bt) * f32                   # segm
        + db * pad8(bt) * Lb * f32                     # segT
        + 9 * P * Lb * taps_itemsize                   # taps scratch
    )
    return int(min(max(2 * need + (4 << 20), 32 << 20), 100 << 20))


def basic_block_in(x, w1, b1, w2, b2, *, max_bt=8, min_grid_steps=2,
                   taps_dtype=jnp.bfloat16):
    """x: (N, C, H, W) NCHW.  w1: (planes, C, 1, 1), w2: (planes, planes, 3, 3).

    b1/b2 are accepted for API parity but are mathematically no-ops before the
    affine=False InstanceNorm, so they are not sent to the kernel.
    `taps_dtype=jnp.bfloat16` runs the conv2 contraction at native MXU rate with f32
    accumulation; pass jnp.float32 for bit-tighter accuracy.
    """
    N, C, H, W = x.shape
    P = w1.shape[0]
    assert C == P, "identity skip path requires inplanes == planes (stride=1, first=False)"
    HW = H * W
    bt = _pick_bt(N, max_bt, min_grid_steps)
    assert N % bt == 0
    Lb = bt * HW
    assert Lb % 128 == 0, "batch-tile * H * W must be a multiple of 128 (lane tiling)"
    assert W + 1 < HW
    del b1, b2  # bias before affine=False InstanceNorm cancels exactly

    # NCHW -> (C, N*H*W): channels on sublanes, all images concatenated on lanes.
    # TODO(synk): when chaining blocks, keep activations in (C, N*HW) layout between
    # blocks and only convert at model entry/exit (saves two HBM relayouts per block).
    x_cl = jnp.transpose(x, (1, 0, 2, 3)).reshape(C, N * HW)

    w1_mat = w1.reshape(P, C).astype(jnp.float32)
    # (P, Cin, kh, kw) -> (P, kh, kw, Cin) -> (P, 9*Cin); contraction idx = tap*Cin + cin
    w2_mat = jnp.transpose(w2, (0, 2, 3, 1)).reshape(P, 9 * P).astype(taps_dtype)

    # Precompute per-tap zero-padding validity masks, tiled once per image in the tile.
    pos = np.arange(HW)
    row, col = pos // W, pos % W
    mask_hw = np.zeros((9, HW), np.float32)
    for k in range(9):
        dy, dx = k // 3 - 1, k % 3 - 1
        mask_hw[k] = ((row + dy >= 0) & (row + dy < H) &
                      (col + dx >= 0) & (col + dx < W)).astype(np.float32)
    masks = jnp.asarray(np.tile(mask_hw, (1, bt)))                    # (9, Lb), dense 2D

    # Segment matrices for per-image InstanceNorm statistics.
    lane_img = np.arange(Lb) // HW
    onehot = (lane_img[:, None] == np.arange(bt)[None, :]).astype(np.float32)  # (Lb, bt)
    segm = jnp.asarray(onehot / float(HW))                            # (Lb, bt)
    segT = jnp.asarray(np.ascontiguousarray(onehot.T))                # (bt, Lb)

    vmem_limit = _vmem_limit_bytes(C, P, Lb, bt, jnp.dtype(taps_dtype).itemsize)

    out = pl.pallas_call(
        functools.partial(basic_block_in_kernel, W=W),
        out_shape=jax.ShapeDtypeStruct((P, N * HW), x.dtype),
        grid_spec=pltpu.PrefetchScalarGridSpec(
            num_scalar_prefetch=0,
            grid=(N // bt,),
            in_specs=[
                pl.BlockSpec((C, Lb), lambda n: (0, n)),          # x slab
                pl.BlockSpec((P, C), lambda n: (0, 0)),           # w1
                pl.BlockSpec((P, 9 * P), lambda n: (0, 0)),       # stacked w2
                pl.BlockSpec((9, Lb), lambda n: (0, 0)),          # tap masks (2D)
                pl.BlockSpec((Lb, bt), lambda n: (0, 0)),         # segment-mean matrix
                pl.BlockSpec((bt, Lb), lambda n: (0, 0)),         # broadcast-back matrix
            ],
            out_specs=pl.BlockSpec((P, Lb), lambda n: (0, n)),
            scratch_shapes=[pltpu.VMEM((9 * P, Lb), taps_dtype)],
        ),
        compiler_params=pltpu.CompilerParams(
            dimension_semantics=("parallel",),
            vmem_limit_bytes=vmem_limit),
    )(x_cl, w1_mat, w2_mat, masks, segm, segT)

    return out.reshape(P, N, H, W).transpose(1, 0, 2, 3)


def reference_forward(x, w1, b1, w2, b2):
    """Pure-JAX reference matching the PyTorch forward (stride=1, first=False),
    including the conv biases (which cancel under affine=False InstanceNorm)."""
    def inorm(y):
        mu = jnp.mean(y, axis=(2, 3), keepdims=True)
        var = jnp.mean(jnp.square(y - mu), axis=(2, 3), keepdims=True)
        return (y - mu) * jax.lax.rsqrt(var + EPS)

    def lrelu(y):
        return jnp.where(y >= 0, y, LRELU_SLOPE * y)

    dn = ('NCHW', 'OIHW', 'NCHW')
    y1 = jax.lax.conv_general_dilated(x, w1, (1, 1), 'VALID',
                                      dimension_numbers=dn,
                                      precision='highest') + b1.reshape(1, -1, 1, 1)
    y1 = lrelu(inorm(y1))
    y2 = jax.lax.conv_general_dilated(y1, w2, (1, 1), ((1, 1), (1, 1)),
                                      dimension_numbers=dn,
                                      precision='highest') + b2.reshape(1, -1, 1, 1)
    y2 = lrelu(inorm(y2))
    return jnp.maximum(y2 + x, 0.0)


if __name__ == "__main__":
    # stride=1, first=False -> identity skip path; inplanes == planes
    N, C, H, W = 8, 8, 16, 16
    planes = C

    key = jax.random.PRNGKey(0)
    k_x, k_w1, k_b1, k_w2, k_b2 = jax.random.split(key, 5)

    x = jax.random.normal(k_x, (N, C, H, W), dtype=jnp.float32)
    w1 = jax.random.normal(k_w1, (planes, C, 1, 1), dtype=jnp.float32) * 0.2
    b1 = jax.random.normal(k_b1, (planes,), dtype=jnp.float32) * 0.1
    w2 = jax.random.normal(k_w2, (planes, planes, 3, 3), dtype=jnp.float32) * 0.1
    b2 = jax.random.normal(k_b2, (planes,), dtype=jnp.float32) * 0.1

    ref = jax.block_until_ready(reference_forward(x, w1, b1, w2, b2))

    # Full-precision taps path: tight tolerance (validates the fused-IN math exactly).
    out_f32 = jax.block_until_ready(
        basic_block_in(x, w1, b1, w2, b2, taps_dtype=jnp.float32))
    np.testing.assert_allclose(np.asarray(out_f32), np.asarray(ref),
                               rtol=2e-3, atol=2e-3)

    # Performance path (bf16 taps + bf16 conv2 weights, f32 accumulation): looser
    # tolerance consistent with bf16 input rounding in the conv2 contraction.
    out_bf16 = jax.block_until_ready(basic_block_in(x, w1, b1, w2, b2))
    np.testing.assert_allclose(np.asarray(out_bf16), np.asarray(ref),
                               rtol=2e-2, atol=2e-2)

    print("KERNEL_OK")
</pallas_src>

<mosaic_0001>
module attributes {stable_mosaic.version = 11 : i64} {
  func.func @basic_block_in_kernel(%arg0: i32, %arg1: memref<8x1024xf32, #tpu.memory_space<vmem>>, %arg2: memref<8x8xf32, #tpu.memory_space<vmem>>, %arg3: memref<8x72xf32, #tpu.memory_space<vmem>>, %arg4: memref<9x1024xf32, #tpu.memory_space<vmem>>, %arg5: memref<1024x4xf32, #tpu.memory_space<vmem>>, %arg6: memref<4x1024xf32, #tpu.memory_space<vmem>>, %arg7: memref<8x1024xf32, #tpu.memory_space<vmem>>, %arg8: memref<72x1024xf32, #tpu.memory_space<vmem>>) attributes {dimension_semantics = [#tpu.dimension_semantics<parallel>], iteration_bounds = array<i64: 2>, scalar_prefetch = 0 : i64, scratch_operands = 1 : i64, tpu.core_type = #tpu.core_type<tc>, window_params = [{transform_indices = @transform_0, window_bounds = array<i64: 8, 1024>}, {pipeline_mode = #tpu.pipeline_mode<synchronous>, transform_indices = @transform_1, window_bounds = array<i64: 8, 8>}, {pipeline_mode = #tpu.pipeline_mode<synchronous>, transform_indices = @transform_2, window_bounds = array<i64: 8, 72>}, {pipeline_mode = #tpu.pipeline_mode<synchronous>, transform_indices = @transform_3, window_bounds = array<i64: 9, 1024>}, {pipeline_mode = #tpu.pipeline_mode<synchronous>, transform_indices = @transform_4, window_bounds = array<i64: 1024, 4>}, {pipeline_mode = #tpu.pipeline_mode<synchronous>, transform_indices = @transform_5, window_bounds = array<i64: 4, 1024>}, {transform_indices = @transform_6, window_bounds = array<i64: 8, 1024>}]} {
    %c0 = arith.constant 0 : index
    %c0_0 = arith.constant 0 : index
    %0 = vector.load %arg5[%c0, %c0_0] : memref<1024x4xf32, #tpu.memory_space<vmem>>, vector<1024x4xf32>
    %c0_1 = arith.constant 0 : index
    %c0_2 = arith.constant 0 : index
    %1 = vector.load %arg6[%c0_1, %c0_2] : memref<4x1024xf32, #tpu.memory_space<vmem>>, vector<4x1024xf32>
    %c0_3 = arith.constant 0 : index
    %c0_4 = arith.constant 0 : index
    %2 = vector.load %arg2[%c0_3, %c0_4] : memref<8x8xf32, #tpu.memory_space<vmem>>, vector<8x8xf32>
    %c0_5 = arith.constant 0 : index
    %c0_6 = arith.constant 0 : index
    %3 = vector.load %arg1[%c0_5, %c0_6] : memref<8x1024xf32, #tpu.memory_space<vmem>>, vector<8x1024xf32>
    %cst = arith.constant dense<0.000000e+00> : vector<8x1024xf32>
    %4 = tpu.matmul %2, %3, %cst {dimension_numbers = #tpu.dot_dimension_numbers<[1], [0], [0], [1], [0, 0, 1, 1], [], []>} : vector<8x8xf32>, vector<8x1024xf32>, vector<8x1024xf32> -> vector<8x1024xf32>
    %5 = arith.mulf %4, %4 : vector<8x1024xf32>
    %6 = tpu.concatenate %4, %5 in 0 : vector<8x1024xf32>, vector<8x1024xf32> -> vector<16x1024xf32>
    %cst_7 = arith.constant dense<0.000000e+00> : vector<16x4xf32>
    %7 = tpu.matmul %6, %0, %cst_7 {dimension_numbers = #tpu.dot_dimension_numbers<[1], [0], [0], [1], [0, 0, 1, 1], [], []>} : vector<16x1024xf32>, vector<1024x4xf32>, vector<16x4xf32> -> vector<16x4xf32>
    %8 = vector.extract_strided_slice %7 {offsets = [0, 0], sizes = [8, 4], strides = [1, 1]} : vector<16x4xf32> to vector<8x4xf32>
    %9 = vector.extract_strided_slice %7 {offsets = [8, 0], sizes = [8, 4], strides = [1, 1]} : vector<16x4xf32> to vector<8x4xf32>
    %10 = arith.mulf %8, %8 : vector<8x4xf32>
    %11 = arith.subf %9, %10 : vector<8x4xf32>
    %cst_8 = arith.constant 0.000000e+00 : f32
    %12 = vector.broadcast %cst_8 : f32 to vector<8x4xf32>
    %13 = arith.maximumf %11, %12 : vector<8x4xf32>
    %cst_9 = arith.constant 9.99999974E-6 : f32
    %14 = vector.broadcast %cst_9 : f32 to vector<8x4xf32>
    %15 = arith.addf %13, %14 : vector<8x4xf32>
    %16 = math.rsqrt %15 : vector<8x4xf32>
    %cst_10 = arith.constant 0.000000e+00 : f32
    %17 = vector.broadcast %cst_10 : f32 to vector<8x4xf32>
    %18 = arith.subf %17, %8 : vector<8x4xf32>
    %19 = arith.mulf %18, %16 : vector<8x4xf32>
    %20 = tpu.concatenate %16, %19 in 0 : vector<8x4xf32>, vector<8x4xf32> -> vector<16x4xf32>
    %cst_11 = arith.constant dense<0.000000e+00> : vector<16x1024xf32>
    %21 = tpu.matmul %20, %1, %cst_11 {dimension_numbers = #tpu.dot_dimension_numbers<[1], [0], [0], [1], [0, 0, 1, 1], [], []>} : vector<16x4xf32>, vector<4x1024xf32>, vector<16x1024xf32> -> vector<16x1024xf32>
    %22 = vector.extract_strided_slice %21 {offsets = [0, 0], sizes = [8, 1024], strides = [1, 1]} : vector<16x1024xf32> to vector<8x1024xf32>
    %23 = arith.mulf %4, %22 : vector<8x1024xf32>
    %24 = vector.extract_strided_slice %21 {offsets = [8, 0], sizes = [8, 1024], strides = [1, 1]} : vector<16x1024xf32> to vector<8x1024xf32>
    %25 = arith.addf %23, %24 : vector<8x1024xf32>
    %cst_12 = arith.constant 0.000000e+00 : f32
    %26 = vector.broadcast %cst_12 : f32 to vector<8x1024xf32>
    %27 = arith.cmpf oge, %25, %26 : vector<8x1024xf32>
    %cst_13 = arith.constant 2.000000e-01 : f32
    %28 = vector.broadcast %cst_13 : f32 to vector<8x1024xf32>
    %29 = arith.mulf %28, %25 : vector<8x1024xf32>
    %30 = arith.select %27, %25, %29 : vector<8x1024xi1>, vector<8x1024xf32>
    %c17_i32 = arith.constant 17 : i32
    %31 = tpu.dynamic_rotate %30 by %c17_i32 dim 1 : vector<8x1024xf32>, i32 -> vector<8x1024xf32>
    %c0_14 = arith.constant 0 : index
    %c0_15 = arith.constant 0 : index
    %32 = vector.load %arg4[%c0_14, %c0_15] : memref<9x1024xf32, #tpu.memory_space<vmem>>, vector<1x1024xf32>
    %33 = vector.broadcast %32 : vector<1x1024xf32> to vector<8x1024xf32>
    %34 = arith.mulf %31, %33 : vector<8x1024xf32>
    %c0_16 = arith.constant 0 : index
    %c0_17 = arith.constant 0 : index
    %35 = vector.load %arg8[%c0_16, %c0_17] : memref<72x1024xf32, #tpu.memory_space<vmem>>, vector<8x1024xf32>
    tpu.vector_store %arg8[%c0_16, %c0_17], %34 {strides = array<i32>} : memref<72x1024xf32, #tpu.memory_space<vmem>>, vector<8x1024xf32>,
    %c16_i32 = arith.constant 16 : i32
    %36 = tpu.dynamic_rotate %30 by %c16_i32 dim 1 : vector<8x1024xf32>, i32 -> vector<8x1024xf32>
    %c1 = arith.constant 1 : index
    %c0_18 = arith.constant 0 : index
    %37 = vector.load %arg4[%c1, %c0_18] : memref<9x1024xf32, #tpu.memory_space<vmem>>, vector<1x1024xf32>
    %38 = vector.broadcast %37 : vector<1x1024xf32> to vector<8x1024xf32>
    %39 = arith.mulf %36, %38 : vector<8x1024xf32>
    %c8 = arith.constant 8 : index
    %c0_19 = arith.constant 0 : index
    %40 = vector.load %arg8[%c8, %c0_19] : memref<72x1024xf32, #tpu.memory_space<vmem>>, vector<8x1024xf32>
    tpu.vector_store %arg8[%c8, %c0_19], %39 {strides = array<i32>} : memref<72x1024xf32, #tpu.memory_space<vmem>>, vector<8x1024xf32>,
    %c15_i32 = arith.constant 15 : i32
    %41 = tpu.dynamic_rotate %30 by %c15_i32 dim 1 : vector<8x1024xf32>, i32 -> vector<8x1024xf32>
    %c2 = arith.constant 2 : index
    %c0_20 = arith.constant 0 : index
    %42 = vector.load %arg4[%c2, %c0_20] : memref<9x1024xf32, #tpu.memory_space<vmem>>, vector<1x1024xf32>
    %43 = vector.broadcast %42 : vector<1x1024xf32> to vector<8x1024xf32>
    %44 = arith.mulf %41, %43 : vector<8x1024xf32>
    %c16 = arith.constant 16 : index
    %c0_21 = arith.constant 0 : index
    %45 = vector.load %arg8[%c16, %c0_21] : memref<72x1024xf32, #tpu.memory_space<vmem>>, vector<8x1024xf32>
    tpu.vector_store %arg8[%c16, %c0_21], %44 {strides = array<i32>} : memref<72x1024xf32, #tpu.memory_space<vmem>>, vector<8x1024xf32>,
    %c1_i32 = arith.constant 1 : i32
    %46 = tpu.dynamic_rotate %30 by %c1_i32 dim 1 : vector<8x1024xf32>, i32 -> vector<8x1024xf32>
    %c3 = arith.constant 3 : index
    %c0_22 = arith.constant 0 : index
    %47 = vector.load %arg4[%c3, %c0_22] : memref<9x1024xf32, #tpu.memory_space<vmem>>, vector<1x1024xf32>
    %48 = vector.broadcast %47 : vector<1x1024xf32> to vector<8x1024xf32>
    %49 = arith.mulf %46, %48 : vector<8x1024xf32>
    %c24 = arith.constant 24 : index
    %c0_23 = arith.constant 0 : index
    %50 = vector.load %arg8[%c24, %c0_23] : memref<72x1024xf32, #tpu.memory_space<vmem>>, vector<8x1024xf32>
    tpu.vector_store %arg8[%c24, %c0_23], %49 {strides = array<i32>} : memref<72x1024xf32, #tpu.memory_space<vmem>>, vector<8x1024xf32>,
    %c32 = arith.constant 32 : index
    %c0_24 = arith.constant 0 : index
    %51 = vector.load %arg8[%c32, %c0_24] : memref<72x1024xf32, #tpu.memory_space<vmem>>, vector<8x1024xf32>
    tpu.vector_store %arg8[%c32, %c0_24], %30 {strides = array<i32>} : memref<72x1024xf32, #tpu.memory_space<vmem>>, vector<8x1024xf32>,
    %c1023_i32 = arith.constant 1023 : i32
    %52 = tpu.dynamic_rotate %30 by %c1023_i32 dim 1 : vector<8x1024xf32>, i32 -> vector<8x1024xf32>
    %c5 = arith.constant 5 : index
    %c0_25 = arith.constant 0 : index
    %53 = vector.load %arg4[%c5, %c0_25] : memref<9x1024xf32, #tpu.memory_space<vmem>>, vector<1x1024xf32>
    %54 = vector.broadcast %53 : vector<1x1024xf32> to vector<8x1024xf32>
    %55 = arith.mulf %52, %54 : vector<8x1024xf32>
    %c40 = arith.constant 40 : index
    %c0_26 = arith.constant 0 : index
    %56 = vector.load %arg8[%c40, %c0_26] : memref<72x1024xf32, #tpu.memory_space<vmem>>, vector<8x1024xf32>
    tpu.vector_store %arg8[%c40, %c0_26], %55 {strides = array<i32>} : memref<72x1024xf32, #tpu.memory_space<vmem>>, vector<8x1024xf32>,
    %c1009_i32 = arith.constant 1009 : i32
    %57 = tpu.dynamic_rotate %30 by %c1009_i32 dim 1 : vector<8x1024xf32>, i32 -> vector<8x1024xf32>
    %c6 = arith.constant 6 : index
    %c0_27 = arith.constant 0 : index
    %58 = vector.load %arg4[%c6, %c0_27] : memref<9x1024xf32, #tpu.memory_space<vmem>>, vector<1x1024xf32>
    %59 = vector.broadcast %58 : vector<1x1024xf32> to vector<8x1024xf32>
    %60 = arith.mulf %57, %59 : vector<8x1024xf32>
    %c48 = arith.constant 48 : index
    %c0_28 = arith.constant 0 : index
    %61 = vector.load %arg8[%c48, %c0_28] : memref<72x1024xf32, #tpu.memory_space<vmem>>, vector<8x1024xf32>
    tpu.vector_store %arg8[%c48, %c0_28], %60 {strides = array<i32>} : memref<72x1024xf32, #tpu.memory_space<vmem>>, vector<8x1024xf32>,
    %c1008_i32 = arith.constant 1008 : i32
    %62 = tpu.dynamic_rotate %30 by %c1008_i32 dim 1 : vector<8x1024xf32>, i32 -> vector<8x1024xf32>
    %c7 = arith.constant 7 : index
    %c0_29 = arith.constant 0 : index
    %63 = vector.load %arg4[%c7, %c0_29] : memref<9x1024xf32, #tpu.memory_space<vmem>>, vector<1x1024xf32>
    %64 = vector.broadcast %63 : vector<1x1024xf32> to vector<8x1024xf32>
    %65 = arith.mulf %62, %64 : vector<8x1024xf32>
    %c56 = arith.constant 56 : index
    %c0_30 = arith.constant 0 : index
    %66 = vector.load %arg8[%c56, %c0_30] : memref<72x1024xf32, #tpu.memory_space<vmem>>, vector<8x1024xf32>
    tpu.vector_store %arg8[%c56, %c0_30], %65 {strides = array<i32>} : memref<72x1024xf32, #tpu.memory_space<vmem>>, vector<8x1024xf32>,
    %c1007_i32 = arith.constant 1007 : i32
    %67 = tpu.dynamic_rotate %30 by %c1007_i32 dim 1 : vector<8x1024xf32>, i32 -> vector<8x1024xf32>
    %c8_31 = arith.constant 8 : index
    %c0_32 = arith.constant 0 : index
    %68 = vector.load %arg4[%c8_31, %c0_32] : memref<9x1024xf32, #tpu.memory_space<vmem>>, vector<1x1024xf32>
    %69 = vector.broadcast %68 : vector<1x1024xf32> to vector<8x1024xf32>
    %70 = arith.mulf %67, %69 : vector<8x1024xf32>
    %c64 = arith.constant 64 : index
    %c0_33 = arith.constant 0 : index
    %71 = vector.load %arg8[%c64, %c0_33] : memref<72x1024xf32, #tpu.memory_space<vmem>>, vector<8x1024xf32>
    tpu.vector_store %arg8[%c64, %c0_33], %70 {strides = array<i32>} : memref<72x1024xf32, #tpu.memory_space<vmem>>, vector<8x1024xf32>,
    %c0_34 = arith.constant 0 : index
    %c0_35 = arith.constant 0 : index
    %72 = vector.load %arg3[%c0_34, %c0_35] : memref<8x72xf32, #tpu.memory_space<vmem>>, vector<8x72xf32>
    %c0_36 = arith.constant 0 : index
    %c0_37 = arith.constant 0 : index
    %73 = vector.load %arg8[%c0_36, %c0_37] : memref<72x1024xf32, #tpu.memory_space<vmem>>, vector<72x1024xf32>
    %cst_38 = arith.constant dense<0.000000e+00> : vector<8x1024xf32>
    %74 = tpu.matmul %72, %73, %cst_38 {dimension_numbers = #tpu.dot_dimension_numbers<[1], [0], [0], [1], [0, 0, 1, 1], [], []>} : vector<8x72xf32>, vector<72x1024xf32>, vector<8x1024xf32> -> vector<8x1024xf32>
    %75 = arith.mulf %74, %74 : vector<8x1024xf32>
    %76 = tpu.concatenate %74, %75 in 0 : vector<8x1024xf32>, vector<8x1024xf32> -> vector<16x1024xf32>
    %cst_39 = arith.constant dense<0.000000e+00> : vector<16x4xf32>
    %77 = tpu.matmul %76, %0, %cst_39 {dimension_numbers = #tpu.dot_dimension_numbers<[1], [0], [0], [1], [0, 0, 1, 1], [], []>} : vector<16x1024xf32>, vector<1024x4xf32>, vector<16x4xf32> -> vector<16x4xf32>
    %78 = vector.extract_strided_slice %77 {offsets = [0, 0], sizes = [8, 4], strides = [1, 1]} : vector<16x4xf32> to vector<8x4xf32>
    %79 = vector.extract_strided_slice %77 {offsets = [8, 0], sizes = [8, 4], strides = [1, 1]} : vector<16x4xf32> to vector<8x4xf32>
    %80 = arith.mulf %78, %78 : vector<8x4xf32>
    %81 = arith.subf %79, %80 : vector<8x4xf32>
    %cst_40 = arith.constant 0.000000e+00 : f32
    %82 = vector.broadcast %cst_40 : f32 to vector<8x4xf32>
    %83 = arith.maximumf %81, %82 : vector<8x4xf32>
    %cst_41 = arith.constant 9.99999974E-6 : f32
    %84 = vector.broadcast %cst_41 : f32 to vector<8x4xf32>
    %85 = arith.addf %83, %84 : vector<8x4xf32>
    %86 = math.rsqrt %85 : vector<8x4xf32>
    %cst_42 = arith.constant 0.000000e+00 : f32
    %87 = vector.broadcast %cst_42 : f32 to vector<8x4xf32>
    %88 = arith.subf %87, %78 : vector<8x4xf32>
    %89 = arith.mulf %88, %86 : vector<8x4xf32>
    %90 = tpu.concatenate %86, %89 in 0 : vector<8x4xf32>, vector<8x4xf32> -> vector<16x4xf32>
    %cst_43 = arith.constant dense<0.000000e+00> : vector<16x1024xf32>
    %91 = tpu.matmul %90, %1, %cst_43 {dimension_numbers = #tpu.dot_dimension_numbers<[1], [0], [0], [1], [0, 0, 1, 1], [], []>} : vector<16x4xf32>, vector<4x1024xf32>, vector<16x1024xf32> -> vector<16x1024xf32>
    %92 = vector.extract_strided_slice %91 {offsets = [0, 0], sizes = [8, 1024], strides = [1, 1]} : vector<16x1024xf32> to vector<8x1024xf32>
    %93 = arith.mulf %74, %92 : vector<8x1024xf32>
    %94 = vector.extract_strided_slice %91 {offsets = [8, 0], sizes = [8, 1024], strides = [1, 1]} : vector<16x1024xf32> to vector<8x1024xf32>
    %95 = arith.addf %93, %94 : vector<8x1024xf32>
    %cst_44 = arith.constant 0.000000e+00 : f32
    %96 = vector.broadcast %cst_44 : f32 to vector<8x1024xf32>
    %97 = arith.cmpf oge, %95, %96 : vector<8x1024xf32>
    %cst_45 = arith.constant 2.000000e-01 : f32
    %98 = vector.broadcast %cst_45 : f32 to vector<8x1024xf32>
    %99 = arith.mulf %98, %95 : vector<8x1024xf32>
    %100 = arith.select %97, %95, %99 : vector<8x1024xi1>, vector<8x1024xf32>
    %c0_46 = arith.constant 0 : index
    %c0_47 = arith.constant 0 : index
    %101 = vector.load %arg1[%c0_46, %c0_47] : memref<8x1024xf32, #tpu.memory_space<vmem>>, vector<8x1024xf32>
    %102 = arith.addf %100, %101 : vector<8x1024xf32>
    %cst_48 = arith.constant 0.000000e+00 : f32
    %103 = vector.broadcast %cst_48 : f32 to vector<8x1024xf32>
    %104 = arith.maximumf %102, %103 : vector<8x1024xf32>
    %c0_49 = arith.constant 0 : index
    %c0_50 = arith.constant 0 : index
    %105 = vector.load %arg7[%c0_49, %c0_50] : memref<8x1024xf32, #tpu.memory_space<vmem>>, vector<8x1024xf32>
    tpu.vector_store %arg7[%c0_49, %c0_50], %104 {strides = array<i32>} : memref<8x1024xf32, #tpu.memory_space<vmem>>, vector<8x1024xf32>,
    return
  }
  func.func @transform_0(%arg0: i32) -> (i32, i32) {
    %c0_i32 = arith.constant 0 : i32
    %c0_i32_0 = arith.constant 0 : i32
    return %c0_i32, %arg0 : i32, i32
  }
  func.func @transform_1(%arg0: i32) -> (i32, i32) {
    %c0_i32 = arith.constant 0 : i32
    %c0_i32_0 = arith.constant 0 : i32
    %c0_i32_1 = arith.constant 0 : i32
    return %c0_i32, %c0_i32_0 : i32, i32
  }
  func.func @transform_2(%arg0: i32) -> (i32, i32) {
    %c0_i32 = arith.constant 0 : i32
    %c0_i32_0 = arith.constant 0 : i32
    %c0_i32_1 = arith.constant 0 : i32
    return %c0_i32, %c0_i32_0 : i32, i32
  }
  func.func @transform_3(%arg0: i32) -> (i32, i32) {
    %c0_i32 = arith.constant 0 : i32
    %c0_i32_0 = arith.constant 0 : i32
    %c0_i32_1 = arith.constant 0 : i32
    return %c0_i32, %c0_i32_0 : i32, i32
  }
  func.func @transform_4(%arg0: i32) -> (i32, i32) {
    %c0_i32 = arith.constant 0 : i32
    %c0_i32_0 = arith.constant 0 : i32
    %c0_i32_1 = arith.constant 0 : i32
    return %c0_i32, %c0_i32_0 : i32, i32
  }
  func.func @transform_5(%arg0: i32) -> (i32, i32) {
    %c0_i32 = arith.constant 0 : i32
    %c0_i32_0 = arith.constant 0 : i32
    %c0_i32_1 = arith.constant 0 : i32
    return %c0_i32, %c0_i32_0 : i32, i32
  }
  func.func @transform_6(%arg0: i32) -> (i32, i32) {
    %c0_i32 = arith.constant 0 : i32
    %c0_i32_0 = arith.constant 0 : i32
    return %c0_i32, %arg0 : i32, i32
  }
}

</mosaic_0001>

<bundles_post_ra>
// kernel: tpu_custom_call.1
= control target key start
LH: loop header
LB: loop body
LE: loop exit
PB: predicated region body
PF: predicated region fallthrough
CT: control target
= control target key end

     0   :  { %11 = vsyncpa [#allocation4], 0  ;;  %s4368_s0 = inlined_call_operand.vmem [shape: f32[8,2048], index: 0, kind: input, shape index: {}]   ;;  %s4369_s1 = inlined_call_operand.vmem [shape: f32[8,8], index: 1, kind: input, shape index: {}]   ;;  %s4370_s2 = inlined_call_operand.vmem [shape: f32[8,72], index: 2, kind: input, shape index: {}]   ;;  %s4371_s3 = inlined_call_operand.vmem [shape: f32[9,1024], index: 3, kind: input, shape index: {}]   ;;  %s4372_s4 = inlined_call_operand.vmem [shape: f32[1024,4], index: 4, kind: input, shape index: {}]   ;;  %s4373_s5 = inlined_call_operand.vmem [shape: f32[4,1024], index: 5, kind: input, shape index: {}]   ;;  %s4374_s6 = inlined_call_operand.hbm [shape: f32[8,2048], index: 6, kind: output, shape index: {}]  }
   0x1   :  { %13 = vsyncpa [#allocation4 + $0x1], 0  ;;  %s2729_s21 = smov 0   ;;  %s2731_s22 = smov 0  }
   0x2   :  { %s2733_s23 = smov 0   ;;  %s2735_s24 = smov 0  }
   0x3 LB: > { %s2750_s25 = sadd.s32 4294967295, %s2684_s24   ;;  %s2352_s26 = sadd.s32 4294967294, %s2684_s24   ;;  %s2684_s24 = sphi %s2735_s24, %s4380_s24   ;;  %s2680_s23 = sphi %s2733_s23, %s4379_s23   ;;  %s2676_s22 = sphi %s2731_s22, %s4378_s22   ;;  %s2672_s21 = sphi %s2729_s21, %s4377_s21  }
   0x4   : > { %s2754_s27 = sadd.s32 1, %s2684_s24   ;;  %s157_s28 = sadd.s32 1, %s2680_s23 }
   0x5   : > { %s154_s29 = ssub.s32 %s2684_s24, %s2754_s27  ;;  %p167_p0 = scmp.ne.s32.totalorder %s2680_s23, %s2676_s22 }
   0x6   : > { %p155_p1 = scmp.eq.s32.totalorder %s154_s29, 0  ;;  %p168_p2 = scmp.eq.s32.totalorder %s2750_s25, 1 }
   0x7   : > { %p173_p3 = scmp.ne.s32.totalorder %s2676_s22, %s2672_s21  ;;  %p174_p4 = scmp.eq.s32.totalorder %s2352_s26, 1 }
   0x8   : > { %s2765_s30 = scalar_select %p155_p1, %s2680_s23, %s157_s28  }
   0x9   : > { %p2767_p5 = por %p168_p2, %p167_p0  ;;  %p2771_p6 = por %p174_p4, %p173_p3 }
   0xa   : > { %p2355_p7 = scmp.ge.s32.totalorder %s2684_s24, 1  ;;  %p216_p8 = scmp.lt.s32.totalorder %s2684_s24, 3 }
   0xc   : > { %p217_p9 = pnand %p2355_p7, %p216_p8 }
   0xd   : > { %s2357_s9 = sshll.u32 (!%p217_p9), %s2750_s25, 3  ;;  %s2686_s14 = smov (!%p217_p9), 1  }
   0xe   : > { %220 = sbr.rel (%p217_p9) target bundleno = 1230 (0x4ce), region = 44  ;;  %p247_p10 = scmp.lt.s32.totalorder (!%p217_p9), %s2357_s9, 15 }
   0xf   : > { %s2687_s15 = smov (!%p217_p9), 111   ;;  %s2688_s16 = smov (!%p217_p9), 112  }
  0x10   : > { %s2689_s17 = smov (!%p217_p9), 15   ;;  %s2690_s18 = smov (!%p217_p9), 16  }
  0x11   : > { %s2691_s19 = smov (!%p217_p9), 113   ;;  %s2692_s20 = smov (!%p217_p9), 127  }
  0x12   : > { %s2693_s26 = smov (!%p217_p9), 17   ;;  %s2442_s29 = sshll.u32 (!%p217_p9), %s2750_s25, 6 }
  0x13   : > { %s4382_s9 = smov (!%p247_p10, %s2357_s9), 15  ;;  %v385_v0 = vld [vmem:[%s4369_s1] sm:$0xff]  ;;  %vm394_vm0 = vcmask 64512   ;;  %v268_v9 = vld [vmem:[%s4372_s4 + $0x78] sm:$0xff]  ;;  %v267_v13 = vld [vmem:[%s4372_s4 + $0x70] sm:$0xff]  ;;  %vm792_vm1 = vcmask 1043456  }
  0x14   : > { %s2358_s10 = sshll.u32 %s4382_s9, 3  ;;  %v284_v10 = vld [vmem:[%s4372_s4 + $0xf8] sm:$0xff]  ;;  %v283_v14 = vld [vmem:[%s4372_s4 + $0xf0] sm:$0xff]  ;;  %v266_v16 = vld [vmem:[%s4372_s4 + $0x68] sm:$0xff]  ;;  %vm785_vm4 = vcmask 31744  }
  0x15   : > { %s2781_s13 = scalar_lea.vmem %s4368_s0, %s2358_s10  ;;  %v300_v11 = vld [vmem:[%s4372_s4 + $0x178] sm:$0xff]  ;;  %v299_v15 = vld [vmem:[%s4372_s4 + $0x170] sm:$0xff]  ;;  %v282_v17 = vld [vmem:[%s4372_s4 + $0xe8] sm:$0xff] }
  0x16   : > { %v386_v1 = vld [vmem:[%s2781_s13] sm:$0xff]  ;;  %v388_v2 = vld [vmem:[%s2781_s13 + $0x10] sm:$0xff]  ;;  %v389_v3 = vld [vmem:[%s2781_s13 + $0x18] sm:$0xff] }
  0x17   : > { %413 = vmatpush.msra.mxu0 %v386_v1  ;;  %453 = vmatpush.msra.mxu2 %v388_v2  ;;  %v387_v4 = vld [vmem:[%s2781_s13 + $0x8] sm:$0xff]  ;;  %v392_v5 = vld [vmem:[%s2781_s13 + $0x30] sm:$0xff]  ;;  %v393_v6 = vld [vmem:[%s2781_s13 + $0x38] sm:$0xff] }
  0x18   : > { %473 = vmatpush.msra.mxu3 %v389_v3  ;;  %2359 = vmatmul.msk.f32.vlgmr.msra.gmra.mxu0 %vm394_vm0, %v385_v0  ;;  %v390_v7 = vld [vmem:[%s2781_s13 + $0x20] sm:$0xff]  ;;  %v391_v8 = vld [vmem:[%s2781_s13 + $0x28] sm:$0xff]  ;;  %v316_v12 = vld [vmem:[%s4372_s4 + $0x1f8] sm:$0xff] }
  0x19   : > { %2361 = vmatmul.msk.f32.vlgmr.msra.gmra.mxu2 %vm394_vm0, %v385_v0  ;;  %2362 = vmatmul.msk.f32.vlgmr.msra.gmra.mxu3 %vm394_vm0, %v385_v0  ;;  %v315_v18 = vld [vmem:[%s4372_s4 + $0x1f0] sm:$0xff]  ;;  %v265_v19 = vld [vmem:[%s4372_s4 + $0x60] sm:$0xff]  ;;  %v298_v21 = vld [vmem:[%s4372_s4 + $0x168] sm:$0xff] }
  0x1a   : > { %433 = vmatpush.msra.mxu1 %v387_v4  ;;  %533 = vmatpush.msrb.mxu2 %v392_v5  ;;  %v281_v20 = vld [vmem:[%s4372_s4 + $0xe0] sm:$0xff]  ;;  %v314_v22 = vld [vmem:[%s4372_s4 + $0x1e8] sm:$0xff]  ;;  %v264_v23 = vld [vmem:[%s4372_s4 + $0x58] sm:$0xff] }
  0x1b   : > { %2360 = vmatmul.msk.f32.vlgmr.msra.gmra.mxu1 %vm394_vm0, %v385_v0  ;;  %553 = vmatpush.msrb.mxu3 %v393_v6  ;;  %v280_v24 = vld [vmem:[%s4372_s4 + $0xd8] sm:$0xff]  ;;  %v297_v25 = vld [vmem:[%s4372_s4 + $0x160] sm:$0xff]  ;;  %v263_v27 = vld [vmem:[%s4372_s4 + $0x50] sm:$0xff] }
  0x1c   : > { %493 = vmatpush.msrb.mxu0 %v390_v7  ;;  %513 = vmatpush.msrb.mxu1 %v391_v8  ;;  %v313_v26 = vld [vmem:[%s4372_s4 + $0x1e0] sm:$0xff]  ;;  %v279_v28 = vld [vmem:[%s4372_s4 + $0xd0] sm:$0xff]  ;;  %v296_v29 = vld [vmem:[%s4372_s4 + $0x158] sm:$0xff] }
  0x1d   : > { %612 = vmatpush.msra.mxu2 %v300_v11  ;;  %635 = vmatpush.msra.mxu3 %v316_v12  ;;  %v312_v30 = vld [vmem:[%s4372_s4 + $0x1d8] sm:$0xff]  ;;  %v262_v31 = vld [vmem:[%s4372_s4 + $0x48] sm:$0xff]  ;;  %v295_v33 = vld [vmem:[%s4372_s4 + $0x150] sm:$0xff] }
  0x1e   : > { %566 = vmatpush.msra.mxu0 %v268_v9  ;;  %589 = vmatpush.msra.mxu1 %v284_v10  ;;  %v278_v32 = vld [vmem:[%s4372_s4 + $0xc8] sm:$0xff]  ;;  %v311_v34 = vld [vmem:[%s4372_s4 + $0x1d0] sm:$0xff]  ;;  %v261_v35 = vld [vmem:[%s4372_s4 + $0x40] sm:$0xff] }
  0x1f   : > { %613 = vmatpush.msra.mxu2 %v299_v15  ;;  %636 = vmatpush.msra.mxu3 %v315_v18  ;;  %v277_v36 = vld [vmem:[%s4372_s4 + $0xc0] sm:$0xff]  ;;  %v294_v37 = vld [vmem:[%s4372_s4 + $0x148] sm:$0xff]  ;;  %v260_v39 = vld [vmem:[%s4372_s4 + $0x38] sm:$0xff] }
  0x20   : > { %567 = vmatpush.msra.mxu0 %v267_v13  ;;  %590 = vmatpush.msra.mxu1 %v283_v14  ;;  %v310_v38 = vld [vmem:[%s4372_s4 + $0x1c8] sm:$0xff]  ;;  %v276_v40 = vld [vmem:[%s4372_s4 + $0xb8] sm:$0xff]  ;;  %v293_v41 = vld [vmem:[%s4372_s4 + $0x140] sm:$0xff] }
  0x21   : > { %2363 = vmatmul.msk.f32.vlgmr.msrb.gmra.mxu0 %vm394_vm0, %v385_v0  ;;  %2365 = vmatmul.msk.f32.vlgmr.msrb.gmra.mxu2 %vm394_vm0, %v385_v0  ;;  %v309_v42 = vld [vmem:[%s4372_s4 + $0x1c0] sm:$0xff]  ;;  %v259_v43 = vld [vmem:[%s4372_s4 + $0x30] sm:$0xff]  ;;  %v292_v45 = vld [vmem:[%s4372_s4 + $0x138] sm:$0xff] }
  0x22   : > { %2366 = vmatmul.msk.f32.vlgmr.msrb.gmra.mxu3 %vm394_vm0, %v385_v0  ;;  %568 = vmatpush.msra.mxu0 %v266_v16  ;;  %v275_v44 = vld [vmem:[%s4372_s4 + $0xb0] sm:$0xff]  ;;  %v308_v46 = vld [vmem:[%s4372_s4 + $0x1b8] sm:$0xff]  ;;  %v258_v47 = vld [vmem:[%s4372_s4 + $0x28] sm:$0xff] }
  0x23   : > { %591 = vmatpush.msra.mxu1 %v282_v17  ;;  %614 = vmatpush.msra.mxu2 %v298_v21  ;;  %v274_v48 = vld [vmem:[%s4372_s4 + $0xa8] sm:$0xff]  ;;  %v291_v49 = vld [vmem:[%s4372_s4 + $0x130] sm:$0xff]  ;;  %v257_v51 = vld [vmem:[%s4372_s4 + $0x20] sm:$0xff] }
  0x24   : > { %2364 = vmatmul.msk.f32.vlgmr.msrb.gmra.mxu1 %vm394_vm0, %v385_v0  ;;  %569 = vmatpush.msra.mxu0 %v265_v19  ;;  %v307_v50 = vld [vmem:[%s4372_s4 + $0x1b0] sm:$0xff]  ;;  %v273_v52 = vld [vmem:[%s4372_s4 + $0xa0] sm:$0xff]  ;;  %v290_v53 = vld [vmem:[%s4372_s4 + $0x128] sm:$0xff] }
  0x25   : > { %592 = vmatpush.msra.mxu1 %v281_v20  ;;  %637 = vmatpush.msra.mxu3 %v314_v22  ;;  %v306_v54 = vld [vmem:[%s4372_s4 + $0x1a8] sm:$0xff]  ;;  %v256_v55 = vld [vmem:[%s4372_s4 + $0x18] sm:$0xff]  ;;  %v289_v57 = vld [vmem:[%s4372_s4 + $0x120] sm:$0xff] }
  0x26   : > { %570 = vmatpush.msra.mxu0 %v264_v23  ;;  %615 = vmatpush.msra.mxu2 %v297_v25  ;;  %v272_v56 = vld [vmem:[%s4372_s4 + $0x98] sm:$0xff]  ;;  %v305_v58 = vld [vmem:[%s4372_s4 + $0x1a0] sm:$0xff]  ;;  %v255_v59 = vld [vmem:[%s4372_s4 + $0x10] sm:$0xff] }
  0x27   : > { %593 = vmatpush.msra.mxu1 %v280_v24  ;;  %638 = vmatpush.msra.mxu3 %v313_v26  ;;  %v271_v60 = vld [vmem:[%s4372_s4 + $0x90] sm:$0xff]  ;;  %v288_v61 = vld [vmem:[%s4372_s4 + $0x118] sm:$0xff]  ;;  %v254_v63 = vld [vmem:[%s4372_s4 + $0x8] sm:$0xff] }
  0x28   : > { %571 = vmatpush.msra.mxu0 %v263_v27  ;;  %616 = vmatpush.msra.mxu2 %v296_v29  ;;  %v304_v62 = vld [vmem:[%s4372_s4 + $0x198] sm:$0xff]  ;;  %v270_v0 = vld [vmem:[%s4372_s4 + $0x88] sm:$0xff]  ;;  %v287_v1 = vld [vmem:[%s4372_s4 + $0x110] sm:$0xff] }
  0x29   : > { %594 = vmatpush.msra.mxu1 %v279_v28  ;;  %639 = vmatpush.msra.mxu3 %v312_v30  ;;  %v303_v2 = vld [vmem:[%s4372_s4 + $0x190] sm:$0xff]  ;;  %v253_v3 = vld [vmem:[%s4372_s4] sm:$0xff]  ;;  %v332_v5 = vld [vmem:[%s4372_s4 + $0x278] sm:$0xff] }
  0x2a   : > { %572 = vmatpush.msra.mxu0 %v262_v31  ;;  %617 = vmatpush.msra.mxu2 %v295_v33  ;;  %v269_v4 = vld [vmem:[%s4372_s4 + $0x80] sm:$0xff]  ;;  %v348_v6 = vld [vmem:[%s4372_s4 + $0x2f8] sm:$0xff]  ;;  %v286_v7 = vld [vmem:[%s4372_s4 + $0x108] sm:$0xff] }
  0x2b   : > { %595 = vmatpush.msra.mxu1 %v278_v32  ;;  %640 = vmatpush.msra.mxu3 %v311_v34  ;;  %v302_v8 = vld [vmem:[%s4372_s4 + $0x188] sm:$0xff]  ;;  %v331_v9 = vld [vmem:[%s4372_s4 + $0x270] sm:$0xff]  ;;  %v285_v11 = vld [vmem:[%s4372_s4 + $0x100] sm:$0xff] }
  0x2c   : > { %573 = vmatpush.msra.mxu0 %v261_v35  ;;  %618 = vmatpush.msra.mxu2 %v294_v37  ;;  %v347_v10 = vld [vmem:[%s4372_s4 + $0x2f0] sm:$0xff]  ;;  %v301_v12 = vld [vmem:[%s4372_s4 + $0x180] sm:$0xff]  ;;  %v330_v13 = vld [vmem:[%s4372_s4 + $0x268] sm:$0xff] }
  0x2d   : > { %596 = vmatpush.msra.mxu1 %v277_v36  ;;  %641 = vmatpush.msra.mxu3 %v310_v38  ;;  %v346_v14 = vld [vmem:[%s4372_s4 + $0x2e8] sm:$0xff]  ;;  %v364_v15 = vld [vmem:[%s4372_s4 + $0x378] sm:$0xff]  ;;  %v329_v17 = vld [vmem:[%s4372_s4 + $0x260] sm:$0xff] }
  0x2e   : > { %574 = vmatpush.msra.mxu0 %v260_v39  ;;  %619 = vmatpush.msra.mxu2 %v293_v41  ;;  %v380_v16 = vld [vmem:[%s4372_s4 + $0x3f8] sm:$0xff]  ;;  %v345_v18 = vld [vmem:[%s4372_s4 + $0x2e0] sm:$0xff]  ;;  %v363_v19 = vld [vmem:[%s4372_s4 + $0x370] sm:$0xff] }
  0x2f   : > { %597 = vmatpush.msra.mxu1 %v276_v40  ;;  %642 = vmatpush.msra.mxu3 %v309_v42  ;;  %v379_v20 = vld [vmem:[%s4372_s4 + $0x3f0] sm:$0xff]  ;;  %v328_v21 = vld [vmem:[%s4372_s4 + $0x258] sm:$0xff]  ;;  %v362_v23 = vld [vmem:[%s4372_s4 + $0x368] sm:$0xff] }
  0x30   : > { %575 = vmatpush.msra.mxu0 %v259_v43  ;;  %620 = vmatpush.msra.mxu2 %v292_v45  ;;  %v344_v22 = vld [vmem:[%s4372_s4 + $0x2d8] sm:$0xff]  ;;  %v378_v24 = vld [vmem:[%s4372_s4 + $0x3e8] sm:$0xff]  ;;  %v327_v25 = vld [vmem:[%s4372_s4 + $0x250] sm:$0xff] }
  0x31   : > { %598 = vmatpush.msra.mxu1 %v275_v44  ;;  %643 = vmatpush.msra.mxu3 %v308_v46  ;;  %v343_v26 = vld [vmem:[%s4372_s4 + $0x2d0] sm:$0xff]  ;;  %v361_v27 = vld [vmem:[%s4372_s4 + $0x360] sm:$0xff]  ;;  %v326_v29 = vld [vmem:[%s4372_s4 + $0x248] sm:$0xff] }
  0x32   : > { %576 = vmatpush.msra.mxu0 %v258_v47  ;;  %621 = vmatpush.msra.mxu2 %v291_v49  ;;  %v377_v28 = vld [vmem:[%s4372_s4 + $0x3e0] sm:$0xff]  ;;  %v342_v31 = vld [vmem:[%s4372_s4 + $0x2c8] sm:$0xff]  ;;  %v360_v32 = vld [vmem:[%s4372_s4 + $0x358] sm:$0xff] }
  0x33   : > { %599 = vmatpush.msra.mxu1 %v274_v48  ;;  %644 = vmatpush.msra.mxu3 %v307_v50  ;;  %v325_v30 = vld [vmem:[%s4372_s4 + $0x240] sm:$0xff]  ;;  %v376_v33 = vld [vmem:[%s4372_s4 + $0x3d8] sm:$0xff]  ;;  %v359_v36 = vld [vmem:[%s4372_s4 + $0x350] sm:$0xff] }
  0x34   : > { %577 = vmatpush.msra.mxu0 %v257_v51  ;;  %622 = vmatpush.msra.mxu2 %v290_v53  ;;  %v324_v34 = vld [vmem:[%s4372_s4 + $0x238] sm:$0xff]  ;;  %v341_v35 = vld [vmem:[%s4372_s4 + $0x2c0] sm:$0xff]  ;;  %v375_v37 = vld [vmem:[%s4372_s4 + $0x3d0] sm:$0xff] }
  0x35   : > { %600 = vmatpush.msra.mxu1 %v273_v52  ;;  %645 = vmatpush.msra.mxu3 %v306_v54  ;;  %v323_v38 = vld [vmem:[%s4372_s4 + $0x230] sm:$0xff]  ;;  %v340_v39 = vld [vmem:[%s4372_s4 + $0x2b8] sm:$0xff]  ;;  %v358_v40 = vld [vmem:[%s4372_s4 + $0x348] sm:$0xff] }
  0x36   : > { %578 = vmatpush.msra.mxu0 %v256_v55  ;;  %623 = vmatpush.msra.mxu2 %v289_v57  ;;  %v374_v41 = vld [vmem:[%s4372_s4 + $0x3c8] sm:$0xff]  ;;  %v339_v43 = vld [vmem:[%s4372_s4 + $0x2b0] sm:$0xff]  ;;  %v357_v44 = vld [vmem:[%s4372_s4 + $0x340] sm:$0xff] }
  0x37   : > { %601 = vmatpush.msra.mxu1 %v272_v56  ;;  %646 = vmatpush.msra.mxu3 %v305_v58  ;;  %v322_v42 = vld [vmem:[%s4372_s4 + $0x228] sm:$0xff]  ;;  %v373_v45 = vld [vmem:[%s4372_s4 + $0x3c0] sm:$0xff]  ;;  %v356_v48 = vld [vmem:[%s4372_s4 + $0x338] sm:$0xff] }
  0x38   : > { %579 = vmatpush.msra.mxu0 %v255_v59  ;;  %624 = vmatpush.msra.mxu2 %v288_v61  ;;  %v321_v46 = vld [vmem:[%s4372_s4 + $0x220] sm:$0xff]  ;;  %v338_v47 = vld [vmem:[%s4372_s4 + $0x2a8] sm:$0xff]  ;;  %v372_v49 = vld [vmem:[%s4372_s4 + $0x3b8] sm:$0xff] }
  0x39   : > { %602 = vmatpush.msra.mxu1 %v271_v60  ;;  %647 = vmatpush.msra.mxu3 %v304_v62  ;;  %v320_v50 = vld [vmem:[%s4372_s4 + $0x218] sm:$0xff]  ;;  %v337_v51 = vld [vmem:[%s4372_s4 + $0x2a0] sm:$0xff]  ;;  %v355_v52 = vld [vmem:[%s4372_s4 + $0x330] sm:$0xff] }
  0x3a   : > { %580 = vmatpush.msra.mxu0 %v254_v63  ;;  %625 = vmatpush.msra.mxu2 %v287_v1  ;;  %v371_v53 = vld [vmem:[%s4372_s4 + $0x3b0] sm:$0xff]  ;;  %v336_v55 = vld [vmem:[%s4372_s4 + $0x298] sm:$0xff]  ;;  %v354_v56 = vld [vmem:[%s4372_s4 + $0x328] sm:$0xff] }
  0x3b   : > { %603 = vmatpush.msra.mxu1 %v270_v0  ;;  %648 = vmatpush.msra.mxu3 %v303_v2  ;;  %v319_v54 = vld [vmem:[%s4372_s4 + $0x210] sm:$0xff]  ;;  %v370_v57 = vld [vmem:[%s4372_s4 + $0x3a8] sm:$0xff]  ;;  %v353_v60 = vld [vmem:[%s4372_s4 + $0x320] sm:$0xff] }
  0x3c   : > { %581 = vmatpush.msra.mxu0 %v253_v3  ;;  %626 = vmatpush.msra.mxu2 %v286_v7  ;;  %v318_v58 = vld [vmem:[%s4372_s4 + $0x208] sm:$0xff]  ;;  %v335_v59 = vld [vmem:[%s4372_s4 + $0x290] sm:$0xff]  ;;  %v369_v61 = vld [vmem:[%s4372_s4 + $0x3a0] sm:$0xff] }
  0x3d   : > { %604 = vmatpush.msra.mxu1 %v269_v4  ;;  %649 = vmatpush.msra.mxu3 %v302_v8  ;;  %v317_v62 = vld [vmem:[%s4372_s4 + $0x200] sm:$0xff]  ;;  %v334_v63 = vld [vmem:[%s4372_s4 + $0x288] sm:$0xff]  ;;  %v352_v0 = vld [vmem:[%s4372_s4 + $0x318] sm:$0xff] }
  0x3e   : > { %658 = vmatpush.msrb.mxu0 %v332_v5  ;;  %627 = vmatpush.msra.mxu2 %v285_v11  ;;  %v368_v1 = vld [vmem:[%s4372_s4 + $0x398] sm:$0xff]  ;;  %v333_v2 = vld [vmem:[%s4372_s4 + $0x280] sm:$0xff]  ;;  %v351_v3 = vld [vmem:[%s4372_s4 + $0x310] sm:$0xff] }
  0x3f   : > { %681 = vmatpush.msrb.mxu1 %v348_v6  ;;  %650 = vmatpush.msra.mxu3 %v301_v12  ;;  %v367_v4 = vld [vmem:[%s4372_s4 + $0x390] sm:$0xff]  ;;  %v350_v5 = vld [vmem:[%s4372_s4 + $0x308] sm:$0xff]  ;;  %v349_v7 = vld [vmem:[%s4372_s4 + $0x300] sm:$0xff] }
  0x40   : > { %659 = vmatpush.msrb.mxu0 %v331_v9  ;;  %704 = vmatpush.msrb.mxu2 %v364_v15  ;;  %v366_v6 = vld [vmem:[%s4372_s4 + $0x388] sm:$0xff]  ;;  %v365_v8 = vld [vmem:[%s4372_s4 + $0x380] sm:$0xff] }
  0x41   : > { %682 = vmatpush.msrb.mxu1 %v347_v10  ;;  %727 = vmatpush.msrb.mxu3 %v380_v16 }
  0x42   : > { %660 = vmatpush.msrb.mxu0 %v330_v13  ;;  %705 = vmatpush.msrb.mxu2 %v363_v19 }
  0x43   : > { %683 = vmatpush.msrb.mxu1 %v346_v14  ;;  %728 = vmatpush.msrb.mxu3 %v379_v20 }
  0x44   : > { %661 = vmatpush.msrb.mxu0 %v329_v17  ;;  %706 = vmatpush.msrb.mxu2 %v362_v23 }
  0x45   : > { %684 = vmatpush.msrb.mxu1 %v345_v18  ;;  %729 = vmatpush.msrb.mxu3 %v378_v24 }
  0x46   : > { %662 = vmatpush.msrb.mxu0 %v328_v21  ;;  %707 = vmatpush.msrb.mxu2 %v361_v27 }
  0x47   : > { %685 = vmatpush.msrb.mxu1 %v344_v22  ;;  %730 = vmatpush.msrb.mxu3 %v377_v28 }
  0x48   : > { %663 = vmatpush.msrb.mxu0 %v327_v25  ;;  %708 = vmatpush.msrb.mxu2 %v360_v32 }
  0x49   : > { %686 = vmatpush.msrb.mxu1 %v343_v26  ;;  %731 = vmatpush.msrb.mxu3 %v376_v33 }
  0x4a   : > { %664 = vmatpush.msrb.mxu0 %v326_v29  ;;  %709 = vmatpush.msrb.mxu2 %v359_v36 }
  0x4b   : > { %687 = vmatpush.msrb.mxu1 %v342_v31  ;;  %732 = vmatpush.msrb.mxu3 %v375_v37 }
  0x4c   : > { %665 = vmatpush.msrb.mxu0 %v325_v30  ;;  %710 = vmatpush.msrb.mxu2 %v358_v40  ;;  %v381_v40 = vld [vmem:[%s4373_s5] sm:$0xff] }
  0x4d   : > { %688 = vmatpush.msrb.mxu1 %v341_v35  ;;  %733 = vmatpush.msrb.mxu3 %v374_v41  ;;  %v382_v41 = vld [vmem:[%s4373_s5 + $0x8] sm:$0xff]  ;;  %770 = vst [vmem:[#allocation1] ss:$2 sm:$0xff] %v381_v40 }
  0x4e   : > { %666 = vmatpush.msrb.mxu0 %v324_v34  ;;  %711 = vmatpush.msrb.mxu2 %v357_v44  ;;  %772 = vst [vmem:[#allocation1 + $0x10] ss:$2 sm:$0xff] %v382_v41 }
  0x4f   : > { %689 = vmatpush.msrb.mxu1 %v340_v39  ;;  %734 = vmatpush.msrb.mxu3 %v373_v45 }
  0x50   : > { %667 = vmatpush.msrb.mxu0 %v323_v38  ;;  %712 = vmatpush.msrb.mxu2 %v356_v48 }
  0x51   : > { %690 = vmatpush.msrb.mxu1 %v339_v43  ;;  %735 = vmatpush.msrb.mxu3 %v372_v49 }
  0x52   : > { %668 = vmatpush.msrb.mxu0 %v322_v42  ;;  %713 = vmatpush.msrb.mxu2 %v355_v52 }
  0x53   : > { %691 = vmatpush.msrb.mxu1 %v338_v47  ;;  %736 = vmatpush.msrb.mxu3 %v371_v53 }
  0x54   : > { %669 = vmatpush.msrb.mxu0 %v321_v46  ;;  %714 = vmatpush.msrb.mxu2 %v354_v56  ;;  %v778_v52 = vld.sshfl [vmem:[#allocation1 + $0x8] sm:$0xff pattern:$0x75316420] }
  0x55   : > { %692 = vmatpush.msrb.mxu1 %v337_v51  ;;  %737 = vmatpush.msrb.mxu3 %v370_v57  ;;  %v779_v53 = vld.sshfl [vmem:[#allocation1 + $0x10] sm:$0xff pattern:$0x75316420] }
  0x56   : > { %670 = vmatpush.msrb.mxu0 %v320_v50  ;;  %715 = vmatpush.msrb.mxu2 %v353_v60  ;;  %v777_v50 = vld.sshfl [vmem:[#allocation1] sm:$0xff pattern:$0x75316420] }
  0x57   : > { %693 = vmatpush.msrb.mxu1 %v336_v55  ;;  %738 = vmatpush.msrb.mxu3 %v369_v61  ;;  %1983 = vst [vmem:[#allocation1] ss:$2 sm:$0xff] %v381_v40 }
  0x58   : > { %671 = vmatpush.msrb.mxu0 %v319_v54  ;;  %716 = vmatpush.msrb.mxu2 %v352_v0  ;;  %v780_v54 = vld.sshfl [vmem:[#allocation1 + $0x18] sm:$0xff pattern:$0x75316420] }
  0x59   : > { %694 = vmatpush.msrb.mxu1 %v335_v59  ;;  %739 = vmatpush.msrb.mxu3 %v368_v1  ;;  %1985 = vst [vmem:[#allocation1 + $0x10] ss:$2 sm:$0xff] %v382_v41 }
  0x5a   : > { %672 = vmatpush.msrb.mxu0 %v318_v58  ;;  %717 = vmatpush.msrb.mxu2 %v351_v3 }
  0x5b   : > { %695 = vmatpush.msrb.mxu1 %v334_v63  ;;  %740 = vmatpush.msrb.mxu3 %v367_v4  ;;  %v384_v63 = vld [vmem:[%s4373_s5 + $0x18] sm:$0xff] }
  0x5c   : > { %673 = vmatpush.msrb.mxu0 %v317_v62  ;;  %718 = vmatpush.msrb.mxu2 %v350_v5  ;;  %v383_v62 = vld [vmem:[%s4373_s5 + $0x10] sm:$0xff]  ;;  %776 = vst [vmem:[#allocation1 + $0x30] ss:$2 sm:$0xff] %v384_v63 }
  0x5d   : > { %696 = vmatpush.msrb.mxu1 %v333_v2  ;;  %741 = vmatpush.msrb.mxu3 %v366_v6  ;;  %774 = vst [vmem:[#allocation1 + $0x20] ss:$2 sm:$0xff] %v383_v62 }
  0x5e   : > { %719 = vmatpush.msrb.mxu2 %v349_v7 }
  0x5f   : > { %742 = vmatpush.msrb.mxu3 %v365_v8 }
  0x63   : > { %v783_v5 = vld.sshfl [vmem:[#allocation1 + $0x30] sm:$0xff pattern:$0x75316420]  ;;  %v784_v6 = vld.sshfl [vmem:[#allocation1 + $0x38] sm:$0xff pattern:$0x75316420] }
  0x64   : > { %v781_v3 = vld.sshfl [vmem:[#allocation1 + $0x20] sm:$0xff pattern:$0x75316420]  ;;  %v782_v4 = vld.sshfl [vmem:[#allocation1 + $0x28] sm:$0xff pattern:$0x75316420] }
  0x65   : > { %1987 = vst [vmem:[#allocation1 + $0x20] ss:$2 sm:$0xff] %v383_v62 }
  0x66   : > { %1989 = vst [vmem:[#allocation1 + $0x30] ss:$2 sm:$0xff] %v384_v63 }
  0x95   : > { %v3186_v9 = vpop.f32.mrf.mxu0 }
  0x96   : > { %582 = vmatmul.f32.vlgmr.msra.gmra.mxu0 %v3186_v9  ;;  %v558_v11 = vmul.f32 %v3186_v9, %v3186_v9 }
  0x97   : > { %2367 = vmatpush.msk.msra.mxu0 %vm792_vm1, %v777_v50 }
  0x98   : > { %v3189_v10 = vpop.f32.mrf.mxu1 }
  0x99   : > { %605 = vmatmul.f32.vlgmr.msra.gmra.mxu1 %v3189_v10  ;;  %v559_v14 = vmul.f32 %v3189_v10, %v3189_v10 }
  0x9a   : > { %2370 = vmatpush.msk.msra.mxu1 %vm792_vm1, %v778_v52 }
  0x9c   : > { %v3194_v12 = vpop.f32.mrf.mxu2  ;;  %v3196_v13 = vpop.f32.mrf.mxu3 }
  0x9d   : > { %628 = vmatmul.f32.vlgmr.msra.gmra.mxu2 %v3194_v12  ;;  %651 = vmatmul.f32.vlgmr.msra.gmra.mxu3 %v3196_v13  ;;  %v560_v15 = vmul.f32 %v3194_v12, %v3194_v12  ;;  %v561_v16 = vmul.f32 %v3196_v13, %v3196_v13 }
  0x9e   : > { %585 = vmatmul.f32.gmra.mxu0 %v558_v11  ;;  %v3206_v17 = vpop.f32.mrf.mxu0  ;;  %2373 = vmatpush.msk.msra.mxu2 %vm792_vm1, %v779_v53 }
  0x9f   : > { %v562_v21 = vmul.f32 %v3206_v17, %v3206_v17  ;;  %2376 = vmatpush.msk.msra.mxu3 %vm792_vm1, %v780_v54 }
  0xa1   : > { %608 = vmatmul.f32.gmra.mxu1 %v559_v14  ;;  %v3209_v18 = vpop.f32.mrf.mxu1 }
  0xa2   : > { %v563_v22 = vmul.f32 %v3209_v18, %v3209_v18 }
  0xa4   : > { %v3212_v19 = vpop.f32.mrf.mxu2 }
  0xa5   : > { %631 = vmatmul.f32.gmra.mxu2 %v560_v15  ;;  %654 = vmatmul.f32.gmra.mxu3 %v561_v16  ;;  %v3214_v20 = vpop.f32.mrf.mxu3  ;;  %v564_v23 = vmul.f32 %v3212_v19, %v3212_v19 }
  0xa6   : > { %674 = vmatmul.f32.vlgmr.msrb.gmra.mxu0 %v3206_v17  ;;  %v565_v24 = vmul.f32 %v3214_v20, %v3214_v20 }
  0xa7   : > { %2379 = vmatpush.msk.msrb.mxu0 %vm792_vm1, %v781_v3  ;;  %v2404_v3 = vld [vmem:[%s4371_s3 + $0x40] ss:$8 sm:$0xf0] }
  0xa9   : > { %697 = vmatmul.f32.vlgmr.msrb.gmra.mxu1 %v3209_v18 }
  0xaa   : > { %2382 = vmatpush.msk.msrb.mxu1 %vm792_vm1, %v782_v4 }
  0xad   : > { %720 = vmatmul.f32.vlgmr.msrb.gmra.mxu2 %v3212_v19  ;;  %743 = vmatmul.f32.vlgmr.msrb.gmra.mxu3 %v3214_v20 }
  0xae   : > { %677 = vmatmul.f32.gmra.mxu0 %v562_v21  ;;  %2385 = vmatpush.msk.msrb.mxu2 %vm792_vm1, %v783_v5 }
  0xaf   : > { %2388 = vmatpush.msk.msrb.mxu3 %vm792_vm1, %v784_v6 }
  0xb1   : > { %700 = vmatmul.f32.gmra.mxu1 %v563_v22 }
  0xb5   : > { %723 = vmatmul.f32.gmra.mxu2 %v564_v23  ;;  %746 = vmatmul.f32.gmra.mxu3 %v565_v24 }
 0x113   : > { %v583_v25 = vpop.f32.mrf.mxu0 }
 0x116   : > { %v606_v26 = vpop.f32.mrf.mxu1 }
 0x117   : > { %v607_v31 = vadd.f32 %v606_v26, %v583_v25 }
 0x11b   : > { %v586_v27 = vpop.f32.mrf.mxu0 }
 0x11e   : > { %v609_v28 = vpop.f32.mrf.mxu1 }
 0x11f   : > { %v610_v36 = vadd.f32 %v609_v28, %v586_v27 }
 0x120   : > { %v629_v29 = vpop.f32.mrf.mxu2  ;;  %v652_v30 = vpop.f32.mrf.mxu3 }
 0x121   : > { %v630_v32 = vadd.f32 %v629_v29, %v607_v31 }
 0x123   : > { %v675_v33 = vpop.f32.mrf.mxu0  ;;  %v653_v37 = vadd.f32 %v652_v30, %v630_v32 }
 0x125   : > { %v676_v42 = vadd.f32 %v675_v33, %v653_v37 }
 0x126   : > { %v698_v38 = vpop.f32.mrf.mxu1 }
 0x127   : > { %v699_v47 = vadd.f32 %v698_v38, %v676_v42 }
 0x128   : > { %v632_v34 = vpop.f32.mrf.mxu2  ;;  %v655_v35 = vpop.f32.mrf.mxu3 }
 0x129   : > { %v633_v39 = vadd.f32 %v632_v34, %v610_v36 }
 0x12b   : > { %v656_v43 = vadd.f32 %v655_v35, %v633_v39  ;;  %v678_v44 = vpop.f32.mrf.mxu0 }
 0x12d   : > { %v679_v48 = vadd.f32 %v678_v44, %v656_v43 }
 0x12e   : > { %v701_v51 = vpop.f32.mrf.mxu1 }
 0x12f   : > { %v702_v55 = vadd.f32 %v701_v51, %v679_v48 }
 0x130   : > { %v721_v45 = vpop.f32.mrf.mxu2  ;;  %v744_v46 = vpop.f32.mrf.mxu3 }
 0x131   : > { %v722_v49 = vadd.f32 %v721_v45, %v699_v47 }
 0x133   : > { %v745_v56 = vadd.f32 %v744_v46, %v722_v49 }
 0x135   : > { %v750_v60 = vmul.f32 %v745_v56, %v745_v56  ;;  %v764_v22 = vsub.f32 0.0, %v745_v56 }
 0x138   : > { %v724_v57 = vpop.f32.mrf.mxu2  ;;  %v747_v59 = vpop.f32.mrf.mxu3 }
 0x139   : > { %v725_v58 = vadd.f32 %v724_v57, %v702_v55 }
 0x13b   : > { %v748_v61 = vadd.f32 %v747_v59, %v725_v58 }
 0x13d   : > { %v751_v0 = vsub.f32 %v748_v61, %v750_v60 }
 0x13f   : > { %v752_v1 = vmax.f32 %v751_v0, 0.0 }
 0x141   : > { %v753_v2 = vadd.f32 1e-05, %v752_v1  ;;  %v1049_v1 = vlaneseq }
 0x143   : > { %2490 = vrsqrt.f32 %v753_v2  ;;  %vm760_vm3 = vweird.f32 %v753_v2  ;;  %v3380_v5 = vand.u32 127, %v1049_v1 }
 0x145   : > { %vm1492_vm14 = vcmp.lt.s32.totalorder %v3380_v5, 111  ;;  %vm1430_vm15 = vcmp.lt.s32.totalorder %v3380_v5, 112  ;;  %vm1368_vm0 = vcmp.lt.s32.totalorder %v3380_v5, 113 }
 0x149   : > { %v2491_v7 = vpop.eup %2490 }
 0x14a   : > { %v755_v8 = vmul.f32 %v2491_v7, %v753_v2  ;;  %vm761_vm2 = vweird.f32 %v2491_v7  ;;  %v2403_v2 = vld [vmem:[%s4371_s3 + $0x40] ss:$8 sm:$0xf] }
 0x14b   : > { %vm762_vm5 = vmor %vm760_vm3, %vm761_vm2  ;;  %v3382_v6 = vor.u32 %v2404_v3, %v2403_v2  ;;  %vm1306_vm2 = vcmp.lt.s32.totalorder %v3380_v5, 127  ;;  %vm1236_vm3 = vcmp.lt.s32.totalorder %v3380_v5, 1 }
 0x14c   : > { %v756_v11 = vmul.f32 %v2491_v7, %v755_v8 }
 0x14d   : > { %v1506_v8 = vperm.slane %v3382_v6, 0 }
 0x14e   : > { %v757_v14 = vmul.f32 0.5, %v756_v11  ;;  %v2401_v11 = vld [vmem:[%s4371_s3 + $0x7] ss:$8 sm:$0xf] }
 0x150   : > { %v758_v15 = vsub.f32 1.5, %v757_v14  ;;  %v2402_v14 = vld [vmem:[%s4371_s3 + $0x7] ss:$8 sm:$0xf0] }
 0x152   : > { %v759_v16 = vmul.f32 %v2491_v7, %v758_v15 }
 0x154   : > { %v763_v21 = vsel %vm762_vm5, %v2491_v7, %v759_v16  ;;  %vm1174_vm5 = vcmp.lt.s32.totalorder %v3380_v5, 15 }
 0x155   : > { %2368 = vmatmul.msk.f32.vlgmr.msra.gmra.mxu0 %vm785_vm4, %v763_v21  ;;  %2371 = vmatmul.msk.f32.vlgmr.msra.gmra.mxu1 %vm785_vm4, %v763_v21  ;;  %v765_v23 = vmul.f32 %v764_v22, %v763_v21 }
 0x156   : > { %2374 = vmatmul.msk.f32.vlgmr.msra.gmra.mxu2 %vm785_vm4, %v763_v21  ;;  %2377 = vmatmul.msk.f32.vlgmr.msra.gmra.mxu3 %vm785_vm4, %v763_v21 }
 0x15d   : > { %2369 = vmatmul.msk.f32.gmra.mxu0 %vm785_vm4, %v765_v23  ;;  %2372 = vmatmul.msk.f32.gmra.mxu1 %vm785_vm4, %v765_v23 }
 0x15e   : > { %2375 = vmatmul.msk.f32.gmra.mxu2 %vm785_vm4, %v765_v23  ;;  %2378 = vmatmul.msk.f32.gmra.mxu3 %vm785_vm4, %v765_v23 }
 0x165   : > { %2380 = vmatmul.msk.f32.vlgmr.msrb.gmra.mxu0 %vm785_vm4, %v763_v21  ;;  %2383 = vmatmul.msk.f32.vlgmr.msrb.gmra.mxu1 %vm785_vm4, %v763_v21 }
 0x166   : > { %2386 = vmatmul.msk.f32.vlgmr.msrb.gmra.mxu2 %vm785_vm4, %v763_v21  ;;  %2389 = vmatmul.msk.f32.vlgmr.msrb.gmra.mxu3 %vm785_vm4, %v763_v21 }
 0x16d   : > { %2381 = vmatmul.msk.f32.gmra.mxu0 %vm785_vm4, %v765_v23  ;;  %2384 = vmatmul.msk.f32.gmra.mxu1 %vm785_vm4, %v765_v23 }
 0x16e   : > { %2387 = vmatmul.msk.f32.gmra.mxu2 %vm785_vm4, %v765_v23  ;;  %2390 = vmatmul.msk.f32.gmra.mxu3 %vm785_vm4, %v765_v23  ;;  %v3407_v23 = vor.u32 %v2402_v14, %v2401_v11 }
 0x1d2   : > { %v826_v24 = vpop.f32.mrf.mxu0  ;;  %v849_v25 = vpop.f32.mrf.mxu1 }
 0x1d3   : > { %v993_v26 = vmul.f32 %v826_v24, %v3186_v9  ;;  %v994_v27 = vmul.f32 %v849_v25, %v3189_v10  ;;  %v1444_v25 = vperm.slane %v3407_v23, 0 }
 0x1d9   : > { %v872_v9 = vpop.f32.mrf.mxu2  ;;  %v895_v10 = vpop.f32.mrf.mxu3 }
 0x1da   : > { %v829_v28 = vpop.f32.mrf.mxu0  ;;  %v852_v29 = vpop.f32.mrf.mxu1  ;;  %v995_v37 = vmul.f32 %v872_v9, %v3194_v12  ;;  %v996_v41 = vmul.f32 %v895_v10, %v3196_v13 }
 0x1db   : > { %v1001_v30 = vadd.f32 %v993_v26, %v829_v28  ;;  %v1002_v31 = vadd.f32 %v994_v27, %v852_v29  ;;  %v2399_v28 = vld [vmem:[%s4371_s3 + $0x6] ss:$8 sm:$0xf] }
 0x1dc   : > { %v2400_v29 = vld [vmem:[%s4371_s3 + $0x6] ss:$8 sm:$0xf0] }
 0x1dd   : > { %vm1009_vm6 = vcmp.ge.f32.partialorder %v1001_v30, 0.0  ;;  %v1017_v32 = vmul.f32 0.2, %v1001_v30  ;;  %vm1010_vm7 = vcmp.ge.f32.partialorder %v1002_v31, 0.0  ;;  %v1018_v33 = vmul.f32 0.2, %v1002_v31 }
 0x1df   : > { %v3264_v34 = vsel %vm1009_vm6, %v1001_v30, %v1017_v32  ;;  %v3266_v35 = vsel %vm1010_vm7, %v1002_v31, %v1018_v33  ;;  %v3433_v33 = vor.u32 %v2400_v29, %v2399_v28  ;;  %vm1112_vm6 = vcmp.lt.s32.totalorder %v3380_v5, 16 }
 0x1e0   : > { %1222 = vrot.lane.b32.xlu2 %v3266_v35, %s2686_s14  ;;  %1478 = vrot.lane.b32.xlu1 %v3266_v35, %s2687_s15  ;;  %vm1051_vm7 = vcmp.lt.s32.totalorder %v3380_v5, 17  ;;  %v2503_v5 = vld [vmem:[%s4372_s4 + $0x1d8] sm:$0xff] }
 0x1e1   : > { %1476 = vrot.lane.b32.xlu0 %v3264_v34, %s2687_s15  ;;  %v875_v36 = vpop.f32.mrf.mxu2  ;;  %v898_v40 = vpop.f32.mrf.mxu3  ;;  %v1382_v9 = vperm.slane %v3433_v33, 0  ;;  %v1383_v1 = vperm.slane %v3433_v33, 1 }
 0x1e2   : > { %v1003_v38 = vadd.f32 %v995_v37, %v875_v36  ;;  %v1004_v43 = vadd.f32 %v996_v41, %v898_v40  ;;  %v918_v13 = vpop.f32.mrf.mxu0  ;;  %v2397_v37 = vld [vmem:[%s4371_s3 + $0x5] ss:$8 sm:$0xf] }
 0x1e3   : > { %v997_v46 = vmul.f32 %v918_v13, %v3206_v17  ;;  %v941_v17 = vpop.f32.mrf.mxu1 }
 0x1e4   : > { %v1019_v39 = vmul.f32 0.2, %v1003_v38  ;;  %vm1011_vm8 = vcmp.ge.f32.partialorder %v1003_v38, 0.0  ;;  %v1020_v12 = vmul.f32 0.2, %v1004_v43  ;;  %vm1012_vm9 = vcmp.ge.f32.partialorder %v1004_v43, 0.0 }
 0x1e5   : > { %v998_v56 = vmul.f32 %v941_v17, %v3209_v18 }
 0x1e6   : > { %v3300_v42 = vsel %vm1011_vm8, %v1003_v38, %v1019_v39  ;;  %v3308_v44 = vsel %vm1012_vm9, %v1004_v43, %v1020_v12  ;;  %v2398_v38 = vld [vmem:[%s4371_s3 + $0x5] ss:$8 sm:$0xf0]  ;;  %vm1611_vm8 = vcmask 588800  }
 0x1e7   : > { %v3456_v43 = vor.u32 %v2398_v38, %v2397_v37 }
 0x1e8   : > { %1416 = vrot.lane.b32.xlu2 %v3266_v35, %s2688_s16  ;;  %1414 = vrot.lane.b32.xlu1 %v3264_v34, %s2688_s16 }
 0x1e9   : > { %1160 = vrot.lane.b32.xlu0 %v3266_v35, %s2689_s17  ;;  %v987_v48 = vpop.f32.mrf.mxu3  ;;  %v1320_v12 = vperm.slane %v3456_v43, 0  ;;  %v1321_v11 = vperm.slane %v3456_v43, 1 }
 0x1ea   : > { %v921_v45 = vpop.f32.mrf.mxu0  ;;  %v1000_v52 = vmul.f32 %v987_v48, %v3214_v20  ;;  %v964_v20 = vpop.f32.mrf.mxu2 }
 0x1eb   : > { %v1005_v47 = vadd.f32 %v997_v46, %v921_v45  ;;  %v944_v55 = vpop.f32.mrf.mxu1  ;;  %v999_v63 = vmul.f32 %v964_v20, %v3212_v19  ;;  %v1445_v20 = vperm.slane %v3407_v23, 1 }
 0x1ec   : > { %v1006_v57 = vadd.f32 %v998_v56, %v944_v55 }
 0x1ed   : > { %v1021_v49 = vmul.f32 0.2, %v1005_v47  ;;  %vm1013_vm10 = vcmp.ge.f32.partialorder %v1005_v47, 0.0 }
 0x1ee   : > { %v1022_v60 = vmul.f32 0.2, %v1006_v57  ;;  %vm1014_vm12 = vcmp.ge.f32.partialorder %v1006_v57, 0.0 }
 0x1ef   : > { %v3329_v50 = vsel %vm1013_vm10, %v1005_v47, %v1021_v49 }
 0x1f0   : > { %1098 = vrot.lane.b32.xlu2 %v3266_v35, %s2690_s18  ;;  %1354 = vrot.lane.b32.xlu1 %v3266_v35, %s2691_s19  ;;  %v3355_v61 = vsel %vm1014_vm12, %v1006_v57, %v1022_v60  ;;  %v2395_v57 = vld [vmem:[%s4371_s3 + $0x3] ss:$8 sm:$0xf] }
 0x1f1   : > { %1352 = vrot.lane.b32.xlu0 %v3264_v34, %s2691_s19  ;;  %v990_v51 = vpop.f32.mrf.mxu3  ;;  %v2396_v60 = vld [vmem:[%s4371_s3 + $0x3] ss:$8 sm:$0xf0] }
 0x1f2   : > { %v1008_v53 = vadd.f32 %v1000_v52, %v990_v51  ;;  %v967_v62 = vpop.f32.mrf.mxu2  ;;  %v1507_v52 = vperm.slane %v3382_v6, 1 }
 0x1f3   : > { %v1007_v0 = vadd.f32 %v999_v63, %v967_v62  ;;  %v1508_v62 = vperm.slane %v3382_v6, 2  ;;  %v1509_v63 = vperm.slane %v3382_v6, 3 }
 0x1f4   : > { %v1024_v54 = vmul.f32 0.2, %v1008_v53  ;;  %vm1016_vm11 = vcmp.ge.f32.partialorder %v1008_v53, 0.0 }
 0x1f5   : > { %v1023_v4 = vmul.f32 0.2, %v1007_v0  ;;  %vm1015_vm13 = vcmp.ge.f32.partialorder %v1007_v0, 0.0 }
 0x1f6   : > { %v3345_v58 = vsel %vm1016_vm11, %v1008_v53, %v1024_v54 }
 0x1f7   : > { %v3384_v7 = vsel %vm1015_vm13, %v1007_v0, %v1023_v4  ;;  %v2393_v0 = vld [vmem:[%s4371_s3 + $0x2] ss:$8 sm:$0xf] }
 0x1f8   : > { %1290 = vrot.lane.b32.xlu2 %v3264_v34, %s2692_s20  ;;  %1035 = vrot.lane.b32.xlu1 %v3266_v35, %s2693_s26  ;;  %v2394_v4 = vld [vmem:[%s4371_s3 + $0x2] ss:$8 sm:$0xf0] }
 0x1f9   : > { %1292 = vrot.lane.b32.xlu0 %v3266_v35, %s2692_s20 }
 0x200   : > { %1158 = vrot.lane.b32.xlu2 %v3264_v34, %s2689_s17  ;;  %1220 = vrot.lane.b32.xlu1 %v3264_v34, %s2686_s14 }
 0x201   : > { %1096 = vrot.lane.b32.xlu0 %v3264_v34, %s2690_s18 }
 0x208   : > { %1356 = vrot.lane.b32.xlu2 %v3300_v42, %s2691_s19  ;;  %1033 = vrot.lane.b32.xlu1 %v3264_v34, %s2693_s26 }
 0x209   : > { %1480 = vrot.lane.b32.xlu0 %v3300_v42, %s2687_s15 }
 0x210   : > { %1294 = vrot.lane.b32.xlu2 %v3300_v42, %s2692_s20  ;;  %1418 = vrot.lane.b32.xlu1 %v3300_v42, %s2688_s16 }
 0x211   : > { %1482 = vrot.lane.b32.xlu0 %v3308_v44, %s2687_s15 }
 0x218   : > { %1226 = vrot.lane.b32.xlu2 %v3308_v44, %s2686_s14  ;;  %1420 = vrot.lane.b32.xlu1 %v3308_v44, %s2688_s16 }
 0x219   : > { %1358 = vrot.lane.b32.xlu0 %v3308_v44, %s2691_s19 }
 0x220   : > { %1037 = vrot.lane.b32.xlu2 %v3300_v42, %s2693_s26  ;;  %1162 = vrot.lane.b32.xlu1 %v3300_v42, %s2689_s17 }
 0x221   : > { %1296 = vrot.lane.b32.xlu0 %v3308_v44, %s2692_s20 }
 0x228   : > { %1164 = vrot.lane.b32.xlu1 %v3308_v44, %s2689_s17  ;;  %1484 = vrot.lane.b32.xlu2 %v3329_v50, %s2687_s15 }
 0x229   : > { %1224 = vrot.lane.b32.xlu0 %v3300_v42, %s2686_s14 }
 0x230   : > { %1422 = vrot.lane.b32.xlu1 %v3329_v50, %s2688_s16  ;;  %1298 = vrot.lane.b32.xlu2 %v3329_v50, %s2692_s20 }
 0x231   : > { %1100 = vrot.lane.b32.xlu0 %v3300_v42, %s2690_s18 }
 0x238   : > { %1360 = vrot.lane.b32.xlu1 %v3329_v50, %s2691_s19  ;;  %1490 = vrot.lane.b32.xlu2 %v3345_v58, %s2687_s15 }
 0x239   : > { %1102 = vrot.lane.b32.xlu0 %v3308_v44, %s2690_s18 }
 0x23a   : > { %v3353_v59 = vpop.permute.xlu2 %1222 }
 0x240   : > { %1230 = vrot.lane.b32.xlu1 %v3355_v61, %s2686_s14  ;;  %1234 = vrot.lane.b32.xlu2 %v3345_v58, %s2686_s14 }
 0x241   : > { %1039 = vrot.lane.b32.xlu0 %v3308_v44, %s2693_s26 }
 0x242   : > { %v3363_v18 = vpop.permute.xlu2 %1416 }
 0x248   : > { %1168 = vrot.lane.b32.xlu1 %v3355_v61, %s2689_s17  ;;  %1366 = vrot.lane.b32.xlu2 %v3345_v58, %s2691_s19 }
 0x249   : > { %1486 = vrot.lane.b32.xlu0 %v3355_v61, %s2687_s15 }
 0x24a   : > { %v3378_v19 = vpop.permute.xlu2 %1098 }
 0x250   : > { %1106 = vrot.lane.b32.xlu1 %v3355_v61, %s2690_s18  ;;  %1302 = vrot.lane.b32.xlu2 %v3384_v7, %s2692_s20 }
 0x251   : > { %1424 = vrot.lane.b32.xlu0 %v3355_v61, %s2688_s16 }
 0x252   : > { %v1479_v15 = vpop.permute.xlu1 %1478  ;;  %v3400_v16 = vpop.permute.xlu2 %1290 }
 0x253   : > { %v3402_v21 = vpop.permute.xlu0 %1476 }
 0x254   : > { %v1499_v22 = vsel %vm1492_vm14, %v3402_v21, %v1479_v15 }
 0x255   : > { %v1522_v24 = vmul.f32 %v1506_v8, %v1499_v22  ;;  %v3530_v22 = vor.u32 %v2396_v60, %v2395_v57 }
 0x257   : > { %1622 = vmatpush.msra.mxu0 %v1522_v24  ;;  %v2391_v24 = vld [vmem:[%s4371_s3 + $0x1] ss:$8 sm:$0xf] }
 0x258   : > { %1488 = vrot.lane.b32.xlu1 %v3384_v7, %s2687_s15  ;;  %1047 = vrot.lane.b32.xlu2 %v3345_v58, %s2693_s26 }
 0x259   : > { %1362 = vrot.lane.b32.xlu0 %v3355_v61, %s2691_s19 }
 0x25a   : > { %v3417_v26 = vpop.permute.xlu2 %1158  ;;  %v3419_v27 = vpop.permute.xlu1 %1414 }
 0x25b   : > { %v1437_v30 = vsel %vm1430_vm15, %v3419_v27, %v3363_v18  ;;  %v3431_v31 = vpop.permute.xlu0 %1160 }
 0x25c   : > { %v1460_v32 = vmul.f32 %v1444_v25, %v1437_v30  ;;  %v2392_v25 = vld [vmem:[%s4371_s3 + $0x1] ss:$8 sm:$0xf0] }
 0x25d   : > { %v3549_v38 = vor.u32 %v2392_v25, %v2391_v24 }
 0x25e   : > { %1623 = vmatpush.msra.mxu0 %v1460_v32 }
 0x25f   : > { %v1127_v60 = vperm.slane %v3549_v38, 1 }
 0x260   : > { %1428 = vrot.lane.b32.xlu1 %v3345_v58, %s2688_s16  ;;  %1232 = vrot.lane.b32.xlu2 %v3384_v7, %s2686_s14 }
 0x261   : > { %1426 = vrot.lane.b32.xlu0 %v3384_v7, %s2688_s16 }
 0x262   : > { %v3443_v10 = vpop.permute.xlu2 %1356  ;;  %v1355_v36 = vpop.permute.xlu1 %1354 }
 0x263   : > { %v3451_v39 = vpop.permute.xlu0 %1352  ;;  %v1374_v8 = vsel %vm1368_vm0, %v1355_v36, %v3443_v10 }
 0x264   : > { %v1375_v40 = vsel %vm1368_vm0, %v3451_v39, %v1355_v36  ;;  %v3546_v36 = vor.u32 %v2394_v4, %v2393_v0  ;;  %v1399_v37 = vmul.f32 %v1383_v1, %v1374_v8 }
 0x265   : > { %v1398_v41 = vmul.f32 %v1382_v9, %v1375_v40  ;;  %v1060_v40 = vld [vmem:[%s4371_s3] ss:$8 sm:$0xf] }
 0x267   : > { %1624 = vmatpush.msra.mxu0 %v1398_v41  ;;  %v1061_v41 = vld [vmem:[%s4371_s3] ss:$8 sm:$0xf0] }
 0x268   : > { %1364 = vrot.lane.b32.xlu1 %v3384_v7, %s2691_s19  ;;  %1170 = vrot.lane.b32.xlu2 %v3384_v7, %s2689_s17  ;;  %s2288_s19 = scalar_lea.hbm %s4374_s6, %s2442_s29 }
 0x269   : > { %1172 = vrot.lane.b32.xlu0 %v3345_v58, %s2689_s17 }
 0x26a   : > { %v3466_v13 = vpop.permute.xlu2 %1294  ;;  %v3468_v45 = vpop.permute.xlu1 %1035 }
 0x26b   : > { %v1293_v46 = vpop.permute.xlu0 %1292 }
 0x26c   : > { %v1313_v47 = vsel %vm1306_vm2, %v3400_v16, %v1293_v46 }
 0x26d   : > { %v1336_v48 = vmul.f32 %v1320_v12, %v1313_v47  ;;  %v1446_v47 = vperm.slane %v3407_v23, 2 }
 0x26f   : > { %1625 = vmatpush.msra.mxu0 %v1336_v48 }
 0x270   : > { %1110 = vrot.lane.b32.xlu1 %v3345_v58, %s2690_s18  ;;  %1108 = vrot.lane.b32.xlu2 %v3384_v7, %s2690_s18 }
 0x271   : > { %1304 = vrot.lane.b32.xlu0 %v3345_v58, %s2692_s20  ;;  %1626 = vmatpush.msra.mxu0 %v3264_v34 }
 0x272   : > { %v3480_v49 = vpop.permute.xlu2 %1226  ;;  %v3482_v17 = vpop.permute.xlu1 %1220 }
 0x273   : > { %v3484_v51 = vpop.permute.xlu0 %1096  ;;  %v1243_v48 = vsel %vm1236_vm3, %v3482_v17, %v3353_v59 }
 0x274   : > { %v1119_v8 = vsel %vm1112_vm6, %v3484_v51, %v3378_v19 }
 0x275   : > { %v1143_v24 = vmul.f32 %v1127_v60, %v1119_v8 }
 0x278   : > { %1043 = vrot.lane.b32.xlu1 %v3355_v61, %s2693_s26  ;;  %1045 = vrot.lane.b32.xlu2 %v3384_v7, %s2693_s26 }
 0x279   : > { %1300 = vrot.lane.b32.xlu0 %v3355_v61, %s2692_s20  ;;  %s2292_s20 = sshll.u32 %s2288_s19, 4  ;;  %s2293_s20 = int_to_ptr.hbm [resolvable:$true] %s2292_s20 }
 0x27a   : > { %v3493_v53 = vpop.permute.xlu2 %1037  ;;  %v3495_v34 = vpop.permute.xlu1 %1033  ;;  %s2636_s10 = sshra.s32 %s2293_s20, 4  ;;  %s2637_s10 = int_to_ptr.hbm [resolvable:$true] %s2636_s10 }
 0x27b   : > { %v1481_v54 = vpop.permute.xlu0 %1480  ;;  %s2638_s11 = scalar_lea.hbm %s2637_s10, 64  ;;  %p2643_p0 = scmp.lt.s32.totalorder %s2637_s10, %s4374_s6 }
 0x27c   : > { %v1498_v55 = vsel %vm1492_vm14, %v1479_v15, %v1481_v54  ;;  %p2639_p11 = scmp.ne.s32.totalorder %s2637_s10, %s2638_s11 }
 0x27d   : > { %v1523_v56 = vmul.f32 %v1507_v52, %v1498_v55  ;;  %v1189_v52 = vperm.slane %v3546_v36, 1 }
 0x27e   : > { %p2640_p12 = pnand %p2639_p11, %p2767_p5 }
 0x27f   : > { %1642 = vmatpush.msra.mxu1 %v1523_v56  ;;  %v1384_v56 = vperm.slane %v3433_v33, 2 }
 0x280   : > { %1166 = vrot.lane.b32.xlu1 %v3329_v50, %s2689_s17  ;;  %1104 = vrot.lane.b32.xlu2 %v3329_v50, %s2690_s18  ;;  %p2641_p13 = pneg %p2640_p12  ;;  %s2642_s17 = scalar_lea.hbm %s4374_s6, 128 }
 0x281   : > { %1228 = vrot.lane.b32.xlu0 %v3329_v50, %s2686_s14  ;;  %s243_s14 = sand.u32 1, %s2676_s22   ;;  %p2644_p1 = scmp.lt.s32.totalorder %s2642_s17, %s2638_s11 }
 0x282   : > { %v1419_v2 = vpop.permute.xlu1 %1418  ;;  %v3518_v3 = vpop.permute.xlu2 %1484  ;;  %s2356_s12 = sshll.u32 %s243_s14, 6 }
 0x283   : > { %v1436_v14 = vsel %vm1430_vm15, %v3363_v18, %v1419_v2  ;;  %v1483_v15 = vpop.permute.xlu0 %1482  ;;  %v1312_v18 = vsel %vm1306_vm2, %v1293_v46, %v3466_v13  ;;  %v1251_v46 = vperm.slane %v3530_v22, 1  ;;  %s4316_s28 = scalar_lea.vmem [#allocation3], %s2356_s12  ;;  %p2645_p2 = por %p2644_p1, %p2643_p0 }
 0x284   : > { %v1461_v28 = vmul.f32 %v1445_v20, %v1436_v14  ;;  %v1497_v29 = vsel %vm1492_vm14, %v1481_v54, %v1483_v15  ;;  %v1496_v30 = vsel %vm1492_vm14, %v1483_v15, %v3518_v3  ;;  %v1337_v12 = vmul.f32 %v1321_v11, %v1312_v18  ;;  %s2290_s25 = sshll.u32 %s4316_s28, 4  ;;  %s2291_s25 = int_to_ptr.vmem [resolvable:$true] %s2290_s25 }
 0x285   : > { %v1524_v32 = vmul.f32 %v1508_v62, %v1497_v29  ;;  %v1525_v9 = vmul.f32 %v1509_v63, %v1496_v30  ;;  %v3568_v54 = vor.u32 %v1061_v41, %v1060_v40  ;;  %v1181_v20 = vsel %vm1174_vm5, %v3417_v26, %v3431_v31  ;;  %p2646_p3 = pnand %p2645_p2, %p2641_p13 }
 0x286   : > { %1643 = vmatpush.msra.mxu1 %v1461_v28  ;;  %v1267_v0 = vmul.f32 %v1251_v46, %v1243_v48  ;;  %v1205_v11 = vmul.f32 %v1189_v52, %v1181_v20  ;;  %v1058_v15 = vsel %vm1051_vm7, %v3495_v34, %v3468_v45  ;;  %v1190_v41 = vperm.slane %v3546_v36, 2 }
 0x287   : > { %1662 = vmatpush.msra.mxu2 %v1524_v32  ;;  %1682 = vmatpush.msra.mxu3 %v1525_v9  ;;  %v1065_v14 = vperm.slane %v3568_v54, 1  ;;  %v1250_v32 = vperm.slane %v3530_v22, 0  ;;  %v1252_v9 = vperm.slane %v3530_v22, 2  ;;  %v1128_v20 = vperm.slane %v3549_v38, 2 }
 0x288   : > { %1644 = vmatpush.msra.mxu1 %v1399_v37 }
 0x289   : > { %1041 = vrot.lane.b32.xlu0 %v3329_v50, %s2693_s26  ;;  %s2277_s26 = scalar_lea.sflag [#allocation4], %s243_s14 }
 0x28a   : > { %v1421_v55 = vpop.permute.xlu1 %1420  ;;  %1645 = vmatpush.msra.mxu1 %v1337_v12  ;;  %v3571_v57 = vpop.permute.xlu2 %1298 }
 0x28b   : > { %v1435_v62 = vsel %vm1430_vm15, %v1419_v2, %v1421_v55  ;;  %v1359_v63 = vpop.permute.xlu0 %1358 }
 0x28c   : > { %v1462_v1 = vmul.f32 %v1446_v47, %v1435_v62  ;;  %v1373_v4 = vsel %vm1368_vm0, %v3443_v10, %v1359_v63  ;;  %1646 = vmatpush.msra.mxu1 %v3266_v35  ;;  %v1322_v35 = vperm.slane %v3456_v43, 2  ;;  %v1081_v10 = vmul.f32 %v1065_v14, %v1058_v15 }
 0x28d   : > { %v1400_v2 = vmul.f32 %v1384_v56, %v1373_v4  ;;  %v1447_v56 = vperm.slane %v3407_v23, 3  ;;  %v1323_v14 = vperm.slane %v3456_v43, 3 }
 0x28e   : > { %1647 = vmatpush.msra.mxu1 %v1267_v0  ;;  %1663 = vmatpush.msra.mxu2 %v1462_v1 }
 0x290   : > { %1648 = vmatpush.msra.mxu1 %v1205_v11  ;;  %1664 = vmatpush.msra.mxu2 %v1400_v2  ;;  %v1385_v11 = vperm.slane %v3433_v33, 3 }
 0x292   : > { %v1163_v25 = vpop.permute.xlu1 %1162  ;;  %1649 = vmatpush.msra.mxu1 %v1143_v24  ;;  %v3595_v28 = vpop.permute.xlu2 %1490 }
 0x293   : > { %v1297_v29 = vpop.permute.xlu0 %1296  ;;  %v1180_v46 = vsel %vm1174_vm5, %v3431_v31, %v1163_v25 }
 0x294   : > { %v1311_v30 = vsel %vm1306_vm2, %v3466_v13, %v1297_v29  ;;  %1650 = vmatpush.msra.mxu1 %v1081_v10  ;;  %v1206_v52 = vmul.f32 %v1190_v41, %v1180_v46  ;;  %v1253_v10 = vperm.slane %v3530_v22, 3  ;;  %v1067_v46 = vperm.slane %v3568_v54, 3 }
 0x295   : > { %v1338_v18 = vmul.f32 %v1322_v35, %v1311_v30 }
 0x297   : > { %1665 = vmatpush.msra.mxu2 %v1338_v18  ;;  %v1191_v18 = vperm.slane %v3546_v36, 3 }
 0x299   : > { %1666 = vmatpush.msra.mxu2 %v3300_v42 }
 0x29a   : > { %v3603_v37 = vpop.permute.xlu1 %1164  ;;  %v3605_v40 = vpop.permute.xlu2 %1234 }
 0x29b   : > { %v1225_v12 = vpop.permute.xlu0 %1224  ;;  %v1244_v13 = vsel %vm1236_vm3, %v3605_v40, %v3482_v17  ;;  %v1066_v17 = vperm.slane %v3568_v54, 2 }
 0x29c   : > { %v1242_v42 = vsel %vm1236_vm3, %v3353_v59, %v1225_v12  ;;  %v1266_v47 = vmul.f32 %v1250_v32, %v1244_v13  ;;  %v1057_v59 = vsel %vm1051_vm7, %v3468_v45, %v3493_v53  ;;  %v1310_v45 = vsel %vm1306_vm2, %v1297_v29, %v3571_v57 }
 0x29d   : > { %v1268_v48 = vmul.f32 %v1252_v9, %v1242_v42  ;;  %v1082_v8 = vmul.f32 %v1066_v17, %v1057_v59  ;;  %v1339_v35 = vmul.f32 %v1323_v14, %v1310_v45  ;;  %v1241_v30 = vsel %vm1236_vm3, %v1225_v12, %v3480_v49 }
 0x29e   : > { %1627 = vmatpush.msra.mxu0 %v1266_v47  ;;  %v1179_v29 = vsel %vm1174_vm5, %v1163_v25, %v3603_v37  ;;  %v1269_v32 = vmul.f32 %v1253_v10, %v1241_v30  ;;  %v1513_v42 = vperm.slane %v3382_v6, 7  ;;  %v1511_v59 = vperm.slane %v3382_v6, 5 }
 0x29f   : > { %1667 = vmatpush.msra.mxu2 %v1268_v48  ;;  %v1207_v12 = vmul.f32 %v1191_v18, %v1179_v29  ;;  %v1450_v10 = vperm.slane %v3407_v23, 6  ;;  %v1389_v30 = vperm.slane %v3433_v33, 7 }
 0x2a1   : > { %1668 = vmatpush.msra.mxu2 %v1206_v52 }
 0x2a2   : > { %v3620_v60 = vpop.permute.xlu1 %1422  ;;  %v3645_v24 = vpop.permute.xlu2 %1366 }
 0x2a3   : > { %v1101_v62 = vpop.permute.xlu0 %1100  ;;  %v1434_v31 = vsel %vm1430_vm15, %v1421_v55, %v3620_v60 }
 0x2a4   : > { %v1118_v0 = vsel %vm1112_vm6, %v3378_v19, %v1101_v62  ;;  %v1463_v1 = vmul.f32 %v1447_v56, %v1434_v31 }
 0x2a5   : > { %v1144_v4 = vmul.f32 %v1128_v20, %v1118_v0  ;;  %v1512_v0 = vperm.slane %v3382_v6, 6 }
 0x2a6   : > { %1683 = vmatpush.msra.mxu3 %v1463_v1 }
 0x2a7   : > { %1669 = vmatpush.msra.mxu2 %v1144_v4 }
 0x2a9   : > { %1670 = vmatpush.msra.mxu2 %v1082_v8 }
 0x2aa   : > { %v3635_v55 = vpop.permute.xlu1 %1360  ;;  %v3674_v48 = vpop.permute.xlu2 %1302 }
 0x2ab   : > { %v3640_v2 = vpop.permute.xlu0 %1102  ;;  %v1372_v19 = vsel %vm1368_vm0, %v1359_v63, %v3635_v55  ;;  %v1129_v63 = vperm.slane %v3549_v38, 3 }
 0x2ac   : > { %v1401_v15 = vmul.f32 %v1385_v11, %v1372_v19  ;;  %v1117_v41 = vsel %vm1112_vm6, %v1101_v62, %v3640_v2 }
 0x2ad   : > { %v1145_v47 = vmul.f32 %v1129_v63, %v1117_v41 }
 0x2ae   : > { %1684 = vmatpush.msra.mxu3 %v1401_v15  ;;  %v1451_v15 = vperm.slane %v3407_v23, 7 }
 0x2b0   : > { %1685 = vmatpush.msra.mxu3 %v1339_v35  ;;  %v1449_v35 = vperm.slane %v3407_v23, 5 }
 0x2b2   : > { %v3656_v9 = vpop.permute.xlu1 %1230  ;;  %1686 = vmatpush.msra.mxu3 %v3308_v44  ;;  %v1500_v44 = vsel %vm1492_vm14, %v3595_v28, %v3402_v21  ;;  %v3689_v21 = vpop.permute.xlu2 %1047 }
 0x2b3   : > { %v3662_v13 = vpop.permute.xlu0 %1039  ;;  %v1529_v56 = vmul.f32 %v1513_v42, %v1500_v44 }
 0x2b4   : > { %1687 = vmatpush.msra.mxu3 %v1269_v32  ;;  %v1056_v25 = vsel %vm1051_vm7, %v3493_v53, %v3662_v13  ;;  %v3683_v53 = vld [vmem:[%s4370_s2] sm:$0xff] }
 0x2b5   : > { %v1083_v52 = vmul.f32 %v1067_v46, %v1056_v25  ;;  %2407 = vmatmul.msk.f32.vlgmr.msra.gmra.mxu2 %vm1611_vm8, %v3683_v53  ;;  %2406 = vmatmul.msk.f32.vlgmr.msra.gmra.mxu1 %vm1611_vm8, %v3683_v53 }
 0x2b6   : > { %1688 = vmatpush.msra.mxu3 %v1207_v12 }
 0x2b8   : > { %1689 = vmatpush.msra.mxu3 %v1145_v47  ;;  %v1188_v47 = vperm.slane %v3546_v36, 0 }
 0x2ba   : > { %v3676_v20 = vpop.permute.xlu1 %1168  ;;  %1690 = vmatpush.msra.mxu3 %v1083_v52  ;;  %v3699_v4 = vpop.permute.xlu2 %1232 }
 0x2bb   : > { %v3678_v17 = vpop.permute.xlu0 %1486  ;;  %2408 = vmatmul.msk.f32.vlgmr.msra.gmra.mxu3 %vm1611_vm8, %v3683_v53 }
 0x2bc   : > { %1762 = vmatpush.msrb.mxu3 %v1529_v56 }
 0x2c2   : > { %v3693_v62 = vpop.permute.xlu1 %1106  ;;  %v1171_v46 = vpop.permute.xlu2 %1170 }
 0x2c3   : > { %v3695_v31 = vpop.permute.xlu0 %1424 }
 0x2ca   : > { %v1489_v1 = vpop.permute.xlu1 %1488 }
 0x2cb   : > { %v3701_v8 = vpop.permute.xlu0 %1362  ;;  %v1493_v11 = vsel %vm1492_vm14, %v1489_v1, %v3595_v28  ;;  %v1494_v14 = vsel %vm1492_vm14, %v3678_v17, %v1489_v1  ;;  %v1376_v28 = vsel %vm1368_vm0, %v3645_v24, %v3451_v39  ;;  %v1387_v39 = vperm.slane %v3433_v33, 5 }
 0x2cc   : > { %v1527_v45 = vmul.f32 %v1511_v59, %v1494_v14  ;;  %v1528_v19 = vmul.f32 %v1512_v0, %v1493_v11  ;;  %v1405_v44 = vmul.f32 %v1389_v30, %v1376_v28  ;;  %v1256_v28 = vperm.slane %v3530_v22, 6 }
 0x2ce   : > { %1722 = vmatpush.msrb.mxu1 %v1527_v45  ;;  %1742 = vmatpush.msrb.mxu2 %v1528_v19  ;;  %v1109_v19 = vpop.permute.xlu2 %1108 }
 0x2d2   : > { %v1429_v18 = vpop.permute.xlu1 %1428 }
 0x2d3   : > { %v1427_v29 = vpop.permute.xlu0 %1426  ;;  %v1438_v32 = vsel %vm1430_vm15, %v1429_v18, %v3419_v27  ;;  %v1388_v27 = vperm.slane %v3433_v33, 6 }
 0x2d4   : > { %v1432_v63 = vsel %vm1430_vm15, %v3695_v31, %v1427_v29  ;;  %v1431_v41 = vsel %vm1430_vm15, %v1427_v29, %v1429_v18  ;;  %v1467_v12 = vmul.f32 %v1451_v15, %v1438_v32  ;;  %v1126_v15 = vperm.slane %v3549_v38, 0 }
 0x2d5   : > { %v1465_v42 = vmul.f32 %v1449_v35, %v1432_v63  ;;  %v1466_v25 = vmul.f32 %v1450_v10, %v1431_v41  ;;  %v1326_v35 = vperm.slane %v3456_v43, 6  ;;  %v1064_v10 = vperm.slane %v3568_v54, 0 }
 0x2d6   : > { %1763 = vmatpush.msrb.mxu3 %v1467_v12  ;;  %v1510_v18 = vperm.slane %v3382_v6, 4  ;;  %v1257_v63 = vperm.slane %v3530_v22, 7  ;;  %v1238_v6 = vsel %vm1236_vm3, %v3656_v9, %v3699_v4 }
 0x2d7   : > { %1723 = vmatpush.msrb.mxu1 %v1465_v42  ;;  %1743 = vmatpush.msrb.mxu2 %v1466_v25  ;;  %v1448_v42 = vperm.slane %v3407_v23, 4  ;;  %v1433_v23 = vsel %vm1430_vm15, %v3620_v60, %v3695_v31  ;;  %v1046_v31 = vpop.permute.xlu2 %1045 }
 0x2d8   : > { %1764 = vmatpush.msrb.mxu3 %v1405_v44 }
 0x2da   : > { %v1365_v52 = vpop.permute.xlu1 %1364 }
 0x2db   : > { %v1173_v56 = vpop.permute.xlu0 %1172  ;;  %v1369_v59 = vsel %vm1368_vm0, %v1365_v52, %v3645_v24  ;;  %v1370_v0 = vsel %vm1368_vm0, %v3701_v8, %v1365_v52  ;;  %v1327_v24 = vperm.slane %v3456_v43, 7  ;;  %v1176_v52 = vsel %vm1174_vm5, %v3676_v20, %v1171_v46 }
 0x2dc   : > { %v1182_v1 = vsel %vm1174_vm5, %v1173_v56, %v3417_v26  ;;  %v1403_v11 = vmul.f32 %v1387_v39, %v1370_v0  ;;  %v1404_v14 = vmul.f32 %v1388_v27, %v1369_v59  ;;  %v1059_v26 = vsel %vm1051_vm7, %v3689_v21, %v3495_v34 }
 0x2dd   : > { %v1204_v45 = vmul.f32 %v1188_v47, %v1182_v1  ;;  %v1080_v44 = vmul.f32 %v1064_v10, %v1059_v26  ;;  %v1495_v39 = vsel %vm1492_vm14, %v3518_v3, %v3678_v17  ;;  %v1194_v27 = vperm.slane %v3546_v36, 6 }
 0x2de   : > { %1724 = vmatpush.msrb.mxu1 %v1403_v11  ;;  %1744 = vmatpush.msrb.mxu2 %v1404_v14  ;;  %v1237_v47 = vsel %vm1236_vm3, %v3699_v4, %v3605_v40  ;;  %v1132_v3 = vperm.slane %v3549_v38, 6  ;;  %v1371_v17 = vsel %vm1368_vm0, %v3635_v55, %v3701_v8  ;;  %v1071_v40 = vperm.slane %v3568_v54, 7 }
 0x2df   : > { %1628 = vmatpush.msra.mxu0 %v1204_v45  ;;  %v1195_v4 = vperm.slane %v3546_v36, 7  ;;  %v1526_v60 = vmul.f32 %v1510_v18, %v1495_v39  ;;  %v1175_v59 = vsel %vm1174_vm5, %v1171_v46, %v1173_v56  ;;  %v1324_v0 = vperm.slane %v3456_v43, 4  ;;  %v2496_v39 = vld [vmem:[%s4372_s4 + $0x170] sm:$0xff] }
 0x2e0   : > { %v1325_v1 = vperm.slane %v3456_v43, 5  ;;  %v1273_v11 = vmul.f32 %v1257_v63, %v1237_v47  ;;  %v1464_v55 = vmul.f32 %v1448_v42, %v1433_v23  ;;  %v1210_v8 = vmul.f32 %v1194_v27, %v1176_v52  ;;  %v1105_v63 = vpop.permute.xlu2 %1104  ;;  %v2497_v27 = vld [vmem:[%s4372_s4 + $0x1f0] sm:$0xff]  ;;  %v2498_v23 = vld [vmem:[%s4372_s4 + $0x168] sm:$0xff] }
 0x2e1   : > { %v1133_v14 = vperm.slane %v3549_v38, 7  ;;  %v1070_v46 = vperm.slane %v3568_v54, 6  ;;  %v1052_v56 = vsel %vm1051_vm7, %v1046_v31, %v3689_v21  ;;  %v1131_v42 = vperm.slane %v3549_v38, 5  ;;  %v2499_v52 = vld [vmem:[%s4372_s4 + $0x1e8] sm:$0xff] }
 0x2e2   : > { %v1111_v30 = vpop.permute.xlu1 %1110  ;;  %v1069_v47 = vperm.slane %v3568_v54, 5 }
 0x2e3   : > { %v1305_v29 = vpop.permute.xlu0 %1304  ;;  %v1120_v32 = vsel %vm1112_vm6, %v1111_v30, %v3484_v51 }
 0x2e4   : > { %v1307_v41 = vsel %vm1306_vm2, %v3674_v48, %v1305_v29  ;;  %v1314_v12 = vsel %vm1306_vm2, %v1305_v29, %v3400_v16  ;;  %v1142_v34 = vmul.f32 %v1126_v15, %v1120_v32  ;;  %v1386_v16 = vperm.slane %v3433_v33, 4 }
 0x2e5   : > { %v1342_v25 = vmul.f32 %v1326_v35, %v1307_v41  ;;  %v1343_v51 = vmul.f32 %v1327_v24, %v1314_v12  ;;  %v1272_v33 = vmul.f32 %v1256_v28, %v1238_v6  ;;  %v1211_v35 = vmul.f32 %v1195_v4, %v1175_v59  ;;  %v2505_v59 = vld [vmem:[%s4372_s4 + $0xf8] sm:$0xff] }
 0x2e6   : > { %1629 = vmatpush.msra.mxu0 %v1142_v34  ;;  %v1402_v15 = vmul.f32 %v1386_v16, %v1371_v17  ;;  %v1087_v28 = vmul.f32 %v1071_v40, %v1052_v56  ;;  %v1255_v29 = vperm.slane %v3530_v22, 5  ;;  %v1192_v12 = vperm.slane %v3546_v36, 4  ;;  %v2500_v17 = vld [vmem:[%s4372_s4 + $0x160] sm:$0xff]  ;;  %v2519_v56 = vld [vmem:[%s4372_s4 + $0x1b8] sm:$0xff] }
 0x2e7   : > { %1745 = vmatpush.msrb.mxu2 %v1342_v25  ;;  %1765 = vmatpush.msrb.mxu3 %v1343_v51  ;;  %v1193_v34 = vperm.slane %v3546_v36, 5  ;;  %v1130_v36 = vperm.slane %v3549_v38, 4  ;;  %v1116_v38 = vsel %vm1112_vm6, %v3640_v2, %v1105_v63  ;;  %v1068_v2 = vperm.slane %v3568_v54, 4  ;;  %v2501_v40 = vld [vmem:[%s4372_s4 + $0x1e0] sm:$0xff] }
 0x2e8   : > { %1630 = vmatpush.msra.mxu0 %v1080_v44 }
 0x2e9   : > { %1746 = vmatpush.msrb.mxu2 %v3384_v7  ;;  %1766 = vmatpush.msrb.mxu3 %v3345_v58  ;;  %v1114_v7 = vsel %vm1112_vm6, %v3693_v62, %v1109_v19  ;;  %v1113_v58 = vsel %vm1112_vm6, %v1109_v19, %v1111_v30  ;;  %v1146_v16 = vmul.f32 %v1130_v36, %v1116_v38  ;;  %v2541_v36 = vld [vmem:[%s4372_s4 + $0xb0] sm:$0xff]  ;;  %v2548_v38 = vld [vmem:[%s4372_s4 + $0x20] sm:$0xff] }
 0x2ea   : > { %2405 = vmatmul.msk.f32.vlgmr.msra.gmra.mxu0 %vm1611_vm8, %v3683_v53  ;;  %v3795_v45 = vpop.permute.xlu1 %1043  ;;  %v1148_v18 = vmul.f32 %v1132_v3, %v1114_v7  ;;  %v1149_v21 = vmul.f32 %v1133_v14, %v1113_v58  ;;  %v2512_v14 = vld [vmem:[%s4372_s4 + $0x68] sm:$0xff]  ;;  %v2515_v7 = vld [vmem:[%s4372_s4 + $0x1c0] sm:$0xff] }
 0x2eb   : > { %1702 = vmatpush.msrb.mxu0 %v1526_v60  ;;  %v1301_v43 = vpop.permute.xlu0 %1300  ;;  %1747 = vmatpush.msrb.mxu2 %v1272_v33  ;;  %v1053_v26 = vsel %vm1051_vm7, %v3795_v45, %v1046_v31  ;;  %v2502_v31 = vld [vmem:[%s4372_s4 + $0x158] sm:$0xff]  ;;  %v2516_v58 = vld [vmem:[%s4372_s4 + $0x60] sm:$0xff] }
 0x2ec   : > { %v1308_v24 = vsel %vm1306_vm2, %v1301_v43, %v3674_v48  ;;  %v1309_v10 = vsel %vm1306_vm2, %v3571_v57, %v1301_v43  ;;  %1767 = vmatpush.msrb.mxu3 %v1273_v11  ;;  %v1086_v48 = vmul.f32 %v1070_v46, %v1053_v26  ;;  %v1254_v57 = vperm.slane %v3530_v22, 4  ;;  %v2509_v11 = vld [vmem:[%s4372_s4 + $0xf0] sm:$0xff]  ;;  %v2517_v43 = vld [vmem:[%s4372_s4 + $0xe0] sm:$0xff]  ;;  %v2518_v46 = vld [vmem:[%s4372_s4 + $0x138] sm:$0xff] }
 0x2ed   : > { %v1340_v19 = vmul.f32 %v1324_v0, %v1309_v10  ;;  %v1341_v30 = vmul.f32 %v1325_v1, %v1308_v24  ;;  %1703 = vmatpush.msrb.mxu0 %v1464_v55  ;;  %1748 = vmatpush.msrb.mxu2 %v1210_v8  ;;  %v2506_v0 = vld [vmem:[%s4372_s4 + $0x150] sm:$0xff]  ;;  %v2510_v55 = vld [vmem:[%s4372_s4 + $0x148] sm:$0xff]  ;;  %v2521_v24 = vld [vmem:[%s4372_s4 + $0xd8] sm:$0xff] }
 0x2ee   : > { %1768 = vmatpush.msrb.mxu3 %v1211_v35  ;;  %v2507_v1 = vld [vmem:[%s4372_s4 + $0x1d0] sm:$0xff]  ;;  %v2511_v8 = vld [vmem:[%s4372_s4 + $0x1c8] sm:$0xff]  ;;  %v2520_v35 = vld [vmem:[%s4372_s4 + $0x58] sm:$0xff] }
 0x2ef   : > { %1704 = vmatpush.msrb.mxu0 %v1402_v15  ;;  %1725 = vmatpush.msrb.mxu1 %v1341_v30  ;;  %v2514_v15 = vld [vmem:[%s4372_s4 + $0x140] sm:$0xff]  ;;  %v2522_v10 = vld [vmem:[%s4372_s4 + $0x130] sm:$0xff] }
 0x2f0   : > { %1749 = vmatpush.msrb.mxu2 %v1148_v18  ;;  %1769 = vmatpush.msrb.mxu3 %v1149_v21  ;;  %v2524_v30 = vld [vmem:[%s4372_s4 + $0x50] sm:$0xff]  ;;  %v2526_v18 = vld [vmem:[%s4372_s4 + $0x128] sm:$0xff] }
 0x2f1   : > { %1705 = vmatpush.msrb.mxu0 %v1340_v19  ;;  %1726 = vmatpush.msrb.mxu1 %v3355_v61  ;;  %v2523_v19 = vld [vmem:[%s4372_s4 + $0x1b0] sm:$0xff]  ;;  %v2527_v21 = vld [vmem:[%s4372_s4 + $0x1a8] sm:$0xff] }
 0x2f2   : > { %1750 = vmatpush.msrb.mxu2 %v1086_v48  ;;  %1770 = vmatpush.msrb.mxu3 %v1087_v28  ;;  %v1167_v32 = vpop.permute.xlu1 %1166  ;;  %v2525_v26 = vld [vmem:[%s4372_s4 + $0xd0] sm:$0xff]  ;;  %v2528_v28 = vld [vmem:[%s4372_s4 + $0x48] sm:$0xff] }
 0x2f3   : > { %1706 = vmatpush.msrb.mxu0 %v3329_v50  ;;  %2411 = vmatmul.msk.f32.vlgmr.msrb.gmra.mxu2 %vm1611_vm8, %v3683_v53  ;;  %v1229_v41 = vpop.permute.xlu0 %1228  ;;  %v1177_v50 = vsel %vm1174_vm5, %v1167_v32, %v3676_v20  ;;  %v1178_v6 = vsel %vm1174_vm5, %v3603_v37, %v1167_v32  ;;  %v2495_v20 = vld [vmem:[%s4372_s4 + $0x1f8] sm:$0xff]  ;;  %v1115_v37 = vsel %vm1112_vm6, %v1105_v63, %v3693_v62  ;;  %v2529_v48 = vld [vmem:[%s4372_s4 + $0xc8] sm:$0xff]  ;;  %v2532_v32 = vld [vmem:[%s4372_s4 + $0x40] sm:$0xff] }
 0x2f4   : > { %v1239_v61 = vsel %vm1236_vm3, %v1229_v41, %v3656_v9  ;;  %v1240_v22 = vsel %vm1236_vm3, %v3480_v49, %v1229_v41  ;;  %2412 = vmatmul.msk.f32.vlgmr.msrb.gmra.mxu3 %vm1611_vm8, %v3683_v53  ;;  %v2494_v49 = vld [vmem:[%s4372_s4 + $0x178] sm:$0xff]  ;;  %v1208_v51 = vmul.f32 %v1192_v12, %v1178_v6  ;;  %v1209_v44 = vmul.f32 %v1193_v34, %v1177_v50  ;;  %v2533_v63 = vld [vmem:[%s4372_s4 + $0xc0] sm:$0xff]  ;;  %v2539_v50 = vld [vmem:[%s4372_s4 + $0x190] sm:$0xff] }
 0x2f5   : > { %v1270_v9 = vmul.f32 %v1254_v57, %v1240_v22  ;;  %v1271_v25 = vmul.f32 %v1255_v29, %v1239_v61  ;;  %1829 = vmatpush.msra.mxu2 %v2494_v49  ;;  %1852 = vmatpush.msra.mxu3 %v2495_v20  ;;  %v1147_v62 = vmul.f32 %v1131_v42, %v1115_v37  ;;  %v2530_v57 = vld [vmem:[%s4372_s4 + $0x120] sm:$0xff]  ;;  %v2534_v41 = vld [vmem:[%s4372_s4 + $0x118] sm:$0xff]  ;;  %v2538_v22 = vld [vmem:[%s4372_s4 + $0x110] sm:$0xff] }
 0x2f6   : > { %v2531_v29 = vld [vmem:[%s4372_s4 + $0x1a0] sm:$0xff]  ;;  %v2535_v12 = vld [vmem:[%s4372_s4 + $0x198] sm:$0xff]  ;;  %v2540_v6 = vld [vmem:[%s4372_s4 + $0x30] sm:$0xff] }
 0x2f7   : > { %1707 = vmatpush.msrb.mxu0 %v1270_v9  ;;  %1727 = vmatpush.msrb.mxu1 %v1271_v25  ;;  %v2536_v34 = vld [vmem:[%s4372_s4 + $0x38] sm:$0xff]  ;;  %v2542_v42 = vld [vmem:[%s4372_s4 + $0x108] sm:$0xff]  ;;  %v2546_v20 = vld [vmem:[%s4372_s4 + $0x100] sm:$0xff] }
 0x2f8   : > { %1830 = vmatpush.msra.mxu2 %v2496_v39  ;;  %1853 = vmatpush.msra.mxu3 %v2497_v27  ;;  %v2537_v61 = vld [vmem:[%s4372_s4 + $0xb8] sm:$0xff]  ;;  %v2543_v9 = vld [vmem:[%s4372_s4 + $0x188] sm:$0xff]  ;;  %v2547_v37 = vld [vmem:[%s4372_s4 + $0x180] sm:$0xff] }
 0x2f9   : > { %1708 = vmatpush.msrb.mxu0 %v1208_v51  ;;  %1728 = vmatpush.msrb.mxu1 %v1209_v44  ;;  %v2544_v25 = vld [vmem:[%s4372_s4 + $0x28] sm:$0xff]  ;;  %v2549_v51 = vld [vmem:[%s4372_s4 + $0xa0] sm:$0xff]  ;;  %v2550_v44 = vld [vmem:[%s4372_s4 + $0x378] sm:$0xff] }
 0x2fa   : > { %1831 = vmatpush.msra.mxu2 %v2498_v23  ;;  %1854 = vmatpush.msra.mxu3 %v2499_v52  ;;  %v2545_v49 = vld [vmem:[%s4372_s4 + $0xa8] sm:$0xff]  ;;  %v2551_v39 = vld [vmem:[%s4372_s4 + $0x3f8] sm:$0xff]  ;;  %v2557_v23 = vld [vmem:[%s4372_s4 + $0x90] sm:$0xff] }
 0x2fb   : > { %v1042_v3 = vpop.permute.xlu0 %1041  ;;  %1709 = vmatpush.msrb.mxu0 %v1146_v16  ;;  %1729 = vmatpush.msrb.mxu1 %v1147_v62  ;;  %v2552_v27 = vld [vmem:[%s4372_s4 + $0x18] sm:$0xff]  ;;  %v2554_v62 = vld [vmem:[%s4372_s4 + $0x370] sm:$0xff]  ;;  %v2558_v52 = vld [vmem:[%s4372_s4 + $0x368] sm:$0xff] }
 0x2fc   : > { %v1054_v33 = vsel %vm1051_vm7, %v1042_v3, %v3795_v45  ;;  %v1055_v54 = vsel %vm1051_vm7, %v3662_v13, %v1042_v3  ;;  %1832 = vmatpush.msra.mxu2 %v2500_v17  ;;  %1855 = vmatpush.msra.mxu3 %v2501_v40  ;;  %v2504_v13 = vld [vmem:[%s4372_s4 + $0x78] sm:$0xff]  ;;  %v2513_v45 = vld [vmem:[%s4372_s4 + $0xe8] sm:$0xff]  ;;  %v2562_v17 = vld [vmem:[%s4372_s4 + $0x360] sm:$0xff] }
 0x2fd   : > { %v1084_v4 = vmul.f32 %v1068_v2, %v1055_v54  ;;  %v1085_v60 = vmul.f32 %v1069_v47, %v1054_v33  ;;  %v2553_v16 = vld [vmem:[%s4372_s4 + $0x98] sm:$0xff]  ;;  %v2555_v2 = vld [vmem:[%s4372_s4 + $0x3f0] sm:$0xff]  ;;  %v2559_v3 = vld [vmem:[%s4372_s4 + $0x3e8] sm:$0xff] }
 0x2fe   : > { %1833 = vmatpush.msra.mxu2 %v2502_v31  ;;  %1856 = vmatpush.msra.mxu3 %v2503_v5  ;;  %v2556_v47 = vld [vmem:[%s4372_s4 + $0x10] sm:$0xff]  ;;  %v2560_v33 = vld [vmem:[%s4372_s4 + $0x8] sm:$0xff]  ;;  %v2563_v40 = vld [vmem:[%s4372_s4 + $0x3e0] sm:$0xff] }
 0x2ff   : > { %1710 = vmatpush.msrb.mxu0 %v1084_v4  ;;  %1730 = vmatpush.msrb.mxu1 %v1085_v60  ;;  %v2561_v54 = vld [vmem:[%s4372_s4 + $0x88] sm:$0xff]  ;;  %v2564_v4 = vld [vmem:[%s4372_s4] sm:$0xff]  ;;  %v2566_v31 = vld [vmem:[%s4372_s4 + $0x278] sm:$0xff] }
 0x300   : > { %2409 = vmatmul.msk.f32.vlgmr.msrb.gmra.mxu0 %vm1611_vm8, %v3683_v53  ;;  %2410 = vmatmul.msk.f32.vlgmr.msrb.gmra.mxu1 %vm1611_vm8, %v3683_v53  ;;  %v2508_v53 = vld [vmem:[%s4372_s4 + $0x70] sm:$0xff]  ;;  %v2565_v60 = vld [vmem:[%s4372_s4 + $0x80] sm:$0xff]  ;;  %v2567_v5 = vld [vmem:[%s4372_s4 + $0x2f8] sm:$0xff] }
 0x301   : > { %1783 = vmatpush.msra.mxu0 %v2504_v13  ;;  %1806 = vmatpush.msra.mxu1 %v2505_v59  ;;  %v2568_v13 = vld [vmem:[%s4372_s4 + $0x358] sm:$0xff] }
 0x302   : > { %1834 = vmatpush.msra.mxu2 %v2506_v0  ;;  %1857 = vmatpush.msra.mxu3 %v2507_v1  ;;  %v2569_v59 = vld [vmem:[%s4372_s4 + $0x3d8] sm:$0xff]  ;;  %v2570_v0 = vld [vmem:[%s4372_s4 + $0x270] sm:$0xff] }
 0x303   : > { %1784 = vmatpush.msra.mxu0 %v2508_v53  ;;  %1807 = vmatpush.msra.mxu1 %v2509_v11  ;;  %v2571_v1 = vld [vmem:[%s4372_s4 + $0x2f0] sm:$0xff] }
 0x304   : > { %1835 = vmatpush.msra.mxu2 %v2510_v55  ;;  %1858 = vmatpush.msra.mxu3 %v2511_v8  ;;  %v2572_v53 = vld [vmem:[%s4372_s4 + $0x350] sm:$0xff]  ;;  %v2574_v55 = vld [vmem:[%s4372_s4 + $0x268] sm:$0xff] }
 0x305   : > { %1785 = vmatpush.msra.mxu0 %v2512_v14  ;;  %1808 = vmatpush.msra.mxu1 %v2513_v45  ;;  %v2573_v11 = vld [vmem:[%s4372_s4 + $0x3d0] sm:$0xff]  ;;  %v2575_v8 = vld [vmem:[%s4372_s4 + $0x2e8] sm:$0xff] }
 0x306   : > { %1836 = vmatpush.msra.mxu2 %v2514_v15  ;;  %1859 = vmatpush.msra.mxu3 %v2515_v7  ;;  %v2576_v14 = vld [vmem:[%s4372_s4 + $0x348] sm:$0xff]  ;;  %v2578_v15 = vld [vmem:[%s4372_s4 + $0x260] sm:$0xff] }
 0x307   : > { %1786 = vmatpush.msra.mxu0 %v2516_v58  ;;  %1809 = vmatpush.msra.mxu1 %v2517_v43  ;;  %v2577_v45 = vld [vmem:[%s4372_s4 + $0x3c8] sm:$0xff]  ;;  %v2579_v7 = vld [vmem:[%s4372_s4 + $0x2e0] sm:$0xff] }
 0x308   : > { %1837 = vmatpush.msra.mxu2 %v2518_v46  ;;  %1860 = vmatpush.msra.mxu3 %v2519_v56  ;;  %v2580_v58 = vld [vmem:[%s4372_s4 + $0x340] sm:$0xff]  ;;  %v2582_v46 = vld [vmem:[%s4372_s4 + $0x258] sm:$0xff] }
 0x309   : > { %1787 = vmatpush.msra.mxu0 %v2520_v35  ;;  %1810 = vmatpush.msra.mxu1 %v2521_v24  ;;  %v2581_v43 = vld [vmem:[%s4372_s4 + $0x3c0] sm:$0xff]  ;;  %v2583_v56 = vld [vmem:[%s4372_s4 + $0x2d8] sm:$0xff] }
 0x30a   : > { %1838 = vmatpush.msra.mxu2 %v2522_v10  ;;  %1861 = vmatpush.msra.mxu3 %v2523_v19  ;;  %v2584_v35 = vld [vmem:[%s4372_s4 + $0x338] sm:$0xff]  ;;  %v2586_v10 = vld [vmem:[%s4372_s4 + $0x250] sm:$0xff] }
 0x30b   : > { %1788 = vmatpush.msra.mxu0 %v2524_v30  ;;  %1811 = vmatpush.msra.mxu1 %v2525_v26  ;;  %v2585_v24 = vld [vmem:[%s4372_s4 + $0x3b8] sm:$0xff]  ;;  %v2587_v19 = vld [vmem:[%s4372_s4 + $0x2d0] sm:$0xff] }
 0x30c   : > { %1839 = vmatpush.msra.mxu2 %v2526_v18  ;;  %1862 = vmatpush.msra.mxu3 %v2527_v21  ;;  %v2588_v30 = vld [vmem:[%s4372_s4 + $0x330] sm:$0xff]  ;;  %v2590_v18 = vld [vmem:[%s4372_s4 + $0x248] sm:$0xff] }
 0x30d   : > { %1789 = vmatpush.msra.mxu0 %v2528_v28  ;;  %1812 = vmatpush.msra.mxu1 %v2529_v48  ;;  %v2589_v26 = vld [vmem:[%s4372_s4 + $0x3b0] sm:$0xff]  ;;  %v2591_v21 = vld [vmem:[%s4372_s4 + $0x2c8] sm:$0xff] }
 0x30e   : > { %1840 = vmatpush.msra.mxu2 %v2530_v57  ;;  %1863 = vmatpush.msra.mxu3 %v2531_v29  ;;  %v2592_v28 = vld [vmem:[%s4372_s4 + $0x328] sm:$0xff]  ;;  %v2594_v57 = vld [vmem:[%s4372_s4 + $0x240] sm:$0xff] }
 0x30f   : > { %1790 = vmatpush.msra.mxu0 %v2532_v32  ;;  %1813 = vmatpush.msra.mxu1 %v2533_v63  ;;  %v2593_v48 = vld [vmem:[%s4372_s4 + $0x3a8] sm:$0xff]  ;;  %v2595_v29 = vld [vmem:[%s4372_s4 + $0x2c0] sm:$0xff] }
 0x310   : > { %1841 = vmatpush.msra.mxu2 %v2534_v41  ;;  %1864 = vmatpush.msra.mxu3 %v2535_v12  ;;  %v2596_v32 = vld [vmem:[%s4372_s4 + $0x320] sm:$0xff]  ;;  %v2598_v41 = vld [vmem:[%s4372_s4 + $0x238] sm:$0xff] }
 0x311   : > { %1791 = vmatpush.msra.mxu0 %v2536_v34  ;;  %1814 = vmatpush.msra.mxu1 %v2537_v61  ;;  %v2597_v63 = vld [vmem:[%s4372_s4 + $0x3a0] sm:$0xff]  ;;  %v2599_v12 = vld [vmem:[%s4372_s4 + $0x2b8] sm:$0xff] }
 0x312   : > { %1842 = vmatpush.msra.mxu2 %v2538_v22  ;;  %1865 = vmatpush.msra.mxu3 %v2539_v50  ;;  %v2600_v34 = vld [vmem:[%s4372_s4 + $0x318] sm:$0xff]  ;;  %v2602_v22 = vld [vmem:[%s4372_s4 + $0x230] sm:$0xff] }
 0x313   : > { %1792 = vmatpush.msra.mxu0 %v2540_v6  ;;  %1815 = vmatpush.msra.mxu1 %v2541_v36  ;;  %v2601_v61 = vld [vmem:[%s4372_s4 + $0x398] sm:$0xff]  ;;  %v2603_v50 = vld [vmem:[%s4372_s4 + $0x2b0] sm:$0xff] }
 0x314   : > { %1843 = vmatpush.msra.mxu2 %v2542_v42  ;;  %1866 = vmatpush.msra.mxu3 %v2543_v9  ;;  %v2604_v6 = vld [vmem:[%s4372_s4 + $0x310] sm:$0xff]  ;;  %v2606_v42 = vld [vmem:[%s4372_s4 + $0x228] sm:$0xff] }
 0x315   : > { %1793 = vmatpush.msra.mxu0 %v2544_v25  ;;  %1816 = vmatpush.msra.mxu1 %v2545_v49  ;;  %v2605_v36 = vld [vmem:[%s4372_s4 + $0x390] sm:$0xff]  ;;  %v2607_v9 = vld [vmem:[%s4372_s4 + $0x2a8] sm:$0xff] }
 0x316   : > { %1844 = vmatpush.msra.mxu2 %v2546_v20  ;;  %1867 = vmatpush.msra.mxu3 %v2547_v37  ;;  %v2608_v25 = vld [vmem:[%s4372_s4 + $0x308] sm:$0xff]  ;;  %v2610_v20 = vld [vmem:[%s4372_s4 + $0x220] sm:$0xff] }
 0x317   : > { %1794 = vmatpush.msra.mxu0 %v2548_v38  ;;  %1817 = vmatpush.msra.mxu1 %v2549_v51  ;;  %v2609_v49 = vld [vmem:[%s4372_s4 + $0x388] sm:$0xff]  ;;  %v2611_v37 = vld [vmem:[%s4372_s4 + $0x2a0] sm:$0xff] }
 0x318   : > { %1921 = vmatpush.msrb.mxu2 %v2550_v44  ;;  %1944 = vmatpush.msrb.mxu3 %v2551_v39  ;;  %v2612_v38 = vld [vmem:[%s4372_s4 + $0x300] sm:$0xff]  ;;  %v2614_v44 = vld [vmem:[%s4372_s4 + $0x218] sm:$0xff] }
 0x319   : > { %1795 = vmatpush.msra.mxu0 %v2552_v27  ;;  %1818 = vmatpush.msra.mxu1 %v2553_v16  ;;  %v2613_v51 = vld [vmem:[%s4372_s4 + $0x380] sm:$0xff]  ;;  %v2615_v39 = vld [vmem:[%s4372_s4 + $0x298] sm:$0xff]  ;;  %v2616_v27 = vld [vmem:[%s4372_s4 + $0x210] sm:$0xff] }
 0x31a   : > { %1922 = vmatpush.msrb.mxu2 %v2554_v62  ;;  %1945 = vmatpush.msrb.mxu3 %v2555_v2  ;;  %v2617_v16 = vld [vmem:[%s4372_s4 + $0x290] sm:$0xff]  ;;  %v2618_v62 = vld [vmem:[%s4372_s4 + $0x208] sm:$0xff] }
 0x31b   : > { %1796 = vmatpush.msra.mxu0 %v2556_v47  ;;  %1819 = vmatpush.msra.mxu1 %v2557_v23  ;;  %v2619_v2 = vld [vmem:[%s4372_s4 + $0x288] sm:$0xff]  ;;  %v2620_v47 = vld [vmem:[%s4372_s4 + $0x200] sm:$0xff] }
 0x31c   : > { %1923 = vmatpush.msrb.mxu2 %v2558_v52  ;;  %1946 = vmatpush.msrb.mxu3 %v2559_v3  ;;  %v2621_v23 = vld [vmem:[%s4372_s4 + $0x280] sm:$0xff] }
 0x31d   : > { %1797 = vmatpush.msra.mxu0 %v2560_v33  ;;  %1820 = vmatpush.msra.mxu1 %v2561_v54 }
 0x31e   : > { %1924 = vmatpush.msrb.mxu2 %v2562_v17  ;;  %1947 = vmatpush.msrb.mxu3 %v2563_v40 }
 0x31f   : > { %1798 = vmatpush.msra.mxu0 %v2564_v4  ;;  %1821 = vmatpush.msra.mxu1 %v2565_v60 }
 0x320   : > { %1925 = vmatpush.msrb.mxu2 %v2568_v13  ;;  %1948 = vmatpush.msrb.mxu3 %v2569_v59 }
 0x321   : > { %1875 = vmatpush.msrb.mxu0 %v2566_v31  ;;  %1898 = vmatpush.msrb.mxu1 %v2567_v5 }
 0x322   : > { %1926 = vmatpush.msrb.mxu2 %v2572_v53  ;;  %1949 = vmatpush.msrb.mxu3 %v2573_v11 }
 0x323   : > { %1876 = vmatpush.msrb.mxu0 %v2570_v0  ;;  %1899 = vmatpush.msrb.mxu1 %v2571_v1 }
 0x324   : > { %1927 = vmatpush.msrb.mxu2 %v2576_v14  ;;  %1950 = vmatpush.msrb.mxu3 %v2577_v45 }
 0x325   : > { %1877 = vmatpush.msrb.mxu0 %v2574_v55  ;;  %1900 = vmatpush.msrb.mxu1 %v2575_v8 }
 0x326   : > { %1928 = vmatpush.msrb.mxu2 %v2580_v58  ;;  %1951 = vmatpush.msrb.mxu3 %v2581_v43 }
 0x327   : > { %1878 = vmatpush.msrb.mxu0 %v2578_v15  ;;  %1901 = vmatpush.msrb.mxu1 %v2579_v7 }
 0x328   : > { %1929 = vmatpush.msrb.mxu2 %v2584_v35  ;;  %1952 = vmatpush.msrb.mxu3 %v2585_v24 }
 0x329   : > { %1879 = vmatpush.msrb.mxu0 %v2582_v46  ;;  %1902 = vmatpush.msrb.mxu1 %v2583_v56 }
 0x32a   : > { %1930 = vmatpush.msrb.mxu2 %v2588_v30  ;;  %1953 = vmatpush.msrb.mxu3 %v2589_v26 }
 0x32b   : > { %1880 = vmatpush.msrb.mxu0 %v2586_v10  ;;  %1903 = vmatpush.msrb.mxu1 %v2587_v19 }
 0x32c   : > { %1931 = vmatpush.msrb.mxu2 %v2592_v28  ;;  %1954 = vmatpush.msrb.mxu3 %v2593_v48 }
 0x32d   : > { %1881 = vmatpush.msrb.mxu0 %v2590_v18  ;;  %1904 = vmatpush.msrb.mxu1 %v2591_v21 }
 0x32e   : > { %1932 = vmatpush.msrb.mxu2 %v2596_v32  ;;  %1955 = vmatpush.msrb.mxu3 %v2597_v63  ;;  %v1992_v32 = vld.sshfl [vmem:[#allocation1 + $0x10] sm:$0xff pattern:$0x75316420]  ;;  %v1993_v63 = vld.sshfl [vmem:[#allocation1 + $0x18] sm:$0xff pattern:$0x75316420] }
 0x32f   : > { %1882 = vmatpush.msrb.mxu0 %v2594_v57  ;;  %1905 = vmatpush.msrb.mxu1 %v2595_v29 }
 0x330   : > { %1933 = vmatpush.msrb.mxu2 %v2600_v34  ;;  %1956 = vmatpush.msrb.mxu3 %v2601_v61  ;;  %v1991_v61 = vld.sshfl [vmem:[#allocation1 + $0x8] sm:$0xff pattern:$0x75316420] }
 0x331   : > { %1883 = vmatpush.msrb.mxu0 %v2598_v41  ;;  %1906 = vmatpush.msrb.mxu1 %v2599_v12  ;;  %v1990_v12 = vld.sshfl [vmem:[#allocation1] sm:$0xff pattern:$0x75316420] }
 0x332   : > { %1934 = vmatpush.msrb.mxu2 %v2604_v6  ;;  %1957 = vmatpush.msrb.mxu3 %v2605_v36  ;;  %v4247_v33 = vpop.f32.mrf.mxu1  ;;  %v1997_v36 = vld.sshfl [vmem:[#allocation1 + $0x38] sm:$0xff pattern:$0x75316420] }
 0x333   : > { %1884 = vmatpush.msrb.mxu0 %v2602_v22  ;;  %1907 = vmatpush.msrb.mxu1 %v2603_v50  ;;  %v1776_v40 = vmul.f32 %v4247_v33, %v4247_v33  ;;  %v1996_v22 = vld.sshfl [vmem:[#allocation1 + $0x30] sm:$0xff pattern:$0x75316420] }
 0x334   : > { %1935 = vmatpush.msrb.mxu2 %v2608_v25  ;;  %1958 = vmatpush.msrb.mxu3 %v2609_v49  ;;  %v1995_v25 = vld.sshfl [vmem:[#allocation1 + $0x28] sm:$0xff pattern:$0x75316420] }
 0x335   : > { %1885 = vmatpush.msrb.mxu0 %v2606_v42  ;;  %1908 = vmatpush.msrb.mxu1 %v2607_v9  ;;  %v1994_v42 = vld.sshfl [vmem:[#allocation1 + $0x20] sm:$0xff pattern:$0x75316420] }
 0x336   : > { %1936 = vmatpush.msrb.mxu2 %v2612_v38  ;;  %1959 = vmatpush.msrb.mxu3 %v2613_v51 }
 0x337   : > { %1886 = vmatpush.msrb.mxu0 %v2610_v20  ;;  %1909 = vmatpush.msrb.mxu1 %v2611_v37 }
 0x338   : > { %v4241_v52 = vpop.f32.mrf.mxu2  ;;  %1822 = vmatmul.f32.vlgmr.msra.gmra.mxu1 %v4247_v33 }
 0x339   : > { %1887 = vmatpush.msrb.mxu0 %v2614_v44  ;;  %1910 = vmatpush.msrb.mxu1 %v2615_v39  ;;  %v1777_v54 = vmul.f32 %v4241_v52, %v4241_v52 }
 0x33a   : > { %1845 = vmatmul.f32.vlgmr.msra.gmra.mxu2 %v4241_v52 }
 0x33b   : > { %1888 = vmatpush.msrb.mxu0 %v2616_v27  ;;  %1911 = vmatpush.msrb.mxu1 %v2617_v16 }
 0x33c   : > { %2419 = vmatpush.msk.msra.mxu2 %vm792_vm1, %v1992_v32  ;;  %v2247_v32 = vld [vmem:[%s2781_s13 + $0x18] sm:$0xff] }
 0x33d   : > { %1889 = vmatpush.msrb.mxu0 %v2618_v62  ;;  %1912 = vmatpush.msrb.mxu1 %v2619_v2 }
 0x33e   : > { %v4243_v3 = vpop.f32.mrf.mxu3 }
 0x33f   : > { %1890 = vmatpush.msrb.mxu0 %v2620_v47  ;;  %1913 = vmatpush.msrb.mxu1 %v2621_v23  ;;  %v1778_v17 = vmul.f32 %v4243_v3, %v4243_v3 }
 0x340   : > { %1868 = vmatmul.f32.vlgmr.msra.gmra.mxu3 %v4243_v3  ;;  %1825 = vmatmul.f32.gmra.mxu1 %v1776_v40 }
 0x341   : > { %2422 = vmatpush.msk.msra.mxu3 %vm792_vm1, %v1993_v63  ;;  %2416 = vmatpush.msk.msra.mxu1 %vm792_vm1, %v1991_v61 }
 0x342   : > { %1848 = vmatmul.f32.gmra.mxu2 %v1777_v54 }
 0x348   : > { %1871 = vmatmul.f32.gmra.mxu3 %v1778_v17 }
 0x367   : > { %v4256_v4 = vpop.f32.mrf.mxu0 }
 0x368   : > { %1799 = vmatmul.f32.vlgmr.msra.gmra.mxu0 %v4256_v4  ;;  %v1775_v60 = vmul.f32 %v4256_v4, %v4256_v4 }
 0x369   : > { %2413 = vmatpush.msk.msra.mxu0 %vm792_vm1, %v1990_v12 }
 0x370   : > { %1802 = vmatmul.f32.gmra.mxu0 %v1775_v60 }
 0x376   : > { %v4261_v31 = vpop.f32.mrf.mxu2 }
 0x377   : > { %1937 = vmatmul.f32.vlgmr.msrb.gmra.mxu2 %v4261_v31  ;;  %v4264_v5 = vpop.f32.mrf.mxu3  ;;  %v1781_v13 = vmul.f32 %v4261_v31, %v4261_v31 }
 0x378   : > { %1960 = vmatmul.f32.vlgmr.msrb.gmra.mxu3 %v4264_v5  ;;  %v1782_v59 = vmul.f32 %v4264_v5, %v4264_v5  ;;  %2431 = vmatpush.msk.msrb.mxu2 %vm792_vm1, %v1996_v22 }
 0x379   : > { %2434 = vmatpush.msk.msrb.mxu3 %vm792_vm1, %v1997_v36 }
 0x37d   : > { %v4271_v0 = vpop.f32.mrf.mxu0  ;;  %v4273_v1 = vpop.f32.mrf.mxu1 }
 0x37e   : > { %1891 = vmatmul.f32.vlgmr.msrb.gmra.mxu0 %v4271_v0  ;;  %1914 = vmatmul.f32.vlgmr.msrb.gmra.mxu1 %v4273_v1  ;;  %v1779_v53 = vmul.f32 %v4271_v0, %v4271_v0  ;;  %v1780_v11 = vmul.f32 %v4273_v1, %v4273_v1 }
 0x37f   : > { %1940 = vmatmul.f32.gmra.mxu2 %v1781_v13  ;;  %2425 = vmatpush.msk.msrb.mxu0 %vm792_vm1, %v1994_v42 }
 0x380   : > { %1963 = vmatmul.f32.gmra.mxu3 %v1782_v59  ;;  %2428 = vmatpush.msk.msrb.mxu1 %vm792_vm1, %v1995_v25 }
 0x386   : > { %1894 = vmatmul.f32.gmra.mxu0 %v1779_v53  ;;  %1917 = vmatmul.f32.gmra.mxu1 %v1780_v11 }
 0x3b5   : > { %v1823_v8 = vpop.f32.mrf.mxu1 }
 0x3bd   : > { %v1846_v14 = vpop.f32.mrf.mxu2  ;;  %v1826_v58 = vpop.f32.mrf.mxu1 }
 0x3c3   : > { %v1869_v45 = vpop.f32.mrf.mxu3 }
 0x3c5   : > { %v1849_v43 = vpop.f32.mrf.mxu2 }
 0x3cb   : > { %v1872_v56 = vpop.f32.mrf.mxu3 }
 0x3e5   : > { %v1800_v55 = vpop.f32.mrf.mxu0 }
 0x3e6   : > { %v1824_v15 = vadd.f32 %v1823_v8, %v1800_v55 }
 0x3e8   : > { %v1847_v46 = vadd.f32 %v1846_v14, %v1824_v15 }
 0x3ea   : > { %v1870_v35 = vadd.f32 %v1869_v45, %v1847_v46 }
 0x3ed   : > { %v1803_v7 = vpop.f32.mrf.mxu0 }
 0x3ee   : > { %v1827_v24 = vadd.f32 %v1826_v58, %v1803_v7  ;;  %v2244_v7 = vld [vmem:[%s2781_s13] sm:$0xff]  ;;  %v2245_v58 = vld [vmem:[%s2781_s13 + $0x8] sm:$0xff] }
 0x3f0   : > { %v1850_v18 = vadd.f32 %v1849_v43, %v1827_v24 }
 0x3f2   : > { %v1873_v48 = vadd.f32 %v1872_v56, %v1850_v18 }
 0x3fa   : > { %v1938_v26 = vpop.f32.mrf.mxu2 }
 0x3fb   : > { %v1892_v10 = vpop.f32.mrf.mxu0  ;;  %v1915_v19 = vpop.f32.mrf.mxu1 }
 0x3fc   : > { %v1893_v30 = vadd.f32 %v1892_v10, %v1870_v35  ;;  %v1961_v28 = vpop.f32.mrf.mxu3 }
 0x3fe   : > { %v1916_v21 = vadd.f32 %v1915_v19, %v1893_v30 }
 0x400   : > { %v1939_v57 = vadd.f32 %v1938_v26, %v1916_v21 }
 0x402   : > { %v1962_v50 = vadd.f32 %v1961_v28, %v1939_v57  ;;  %v1941_v9 = vpop.f32.mrf.mxu2 }
 0x403   : > { %v1895_v29 = vpop.f32.mrf.mxu0  ;;  %v1918_v34 = vpop.f32.mrf.mxu1 }
 0x404   : > { %v1896_v41 = vadd.f32 %v1895_v29, %v1873_v48  ;;  %v1964_v20 = vpop.f32.mrf.mxu3  ;;  %v1967_v37 = vmul.f32 %v1962_v50, %v1962_v50  ;;  %v1981_v17 = vsub.f32 0.0, %v1962_v50  ;;  %v2246_v29 = vld [vmem:[%s2781_s13 + $0x10] sm:$0xff] }
 0x406   : > { %v1919_v6 = vadd.f32 %v1918_v34, %v1896_v41 }
 0x408   : > { %v1942_v49 = vadd.f32 %v1941_v9, %v1919_v6 }
 0x40a   : > { %v1965_v38 = vadd.f32 %v1964_v20, %v1942_v49 }
 0x40c   : > { %v1968_v51 = vsub.f32 %v1965_v38, %v1967_v37  ;;  %v2248_v37 = vld [vmem:[%s2781_s13 + $0x20] sm:$0xff]  ;;  %v2249_v38 = vld [vmem:[%s2781_s13 + $0x28] sm:$0xff] }
 0x40e   : > { %v1969_v44 = vmax.f32 %v1968_v51, 0.0 }
 0x410   : > { %v1970_v39 = vadd.f32 1e-05, %v1969_v44 }
 0x412   : > { %2492 = vrsqrt.f32 %v1970_v39  ;;  %vm1977_vm10 = vweird.f32 %v1970_v39 }
 0x418   : > { %v2493_v27 = vpop.eup %2492 }
 0x419   : > { %v1972_v16 = vmul.f32 %v2493_v27, %v1970_v39  ;;  %vm1978_vm9 = vweird.f32 %v2493_v27 }
 0x41a   : > { %vm1979_vm11 = vmor %vm1977_vm10, %vm1978_vm9 }
 0x41b   : > { %v1973_v62 = vmul.f32 %v2493_v27, %v1972_v16 }
 0x41d   : > { %v1974_v2 = vmul.f32 0.5, %v1973_v62 }
 0x41f   : > { %v1975_v47 = vsub.f32 1.5, %v1974_v2 }
 0x421   : > { %v1976_v23 = vmul.f32 %v2493_v27, %v1975_v47 }
 0x423   : > { %v1980_v54 = vsel %vm1979_vm11, %v2493_v27, %v1976_v23 }
 0x424   : > { %2414 = vmatmul.msk.f32.vlgmr.msra.gmra.mxu0 %vm785_vm4, %v1980_v54  ;;  %2417 = vmatmul.msk.f32.vlgmr.msra.gmra.mxu1 %vm785_vm4, %v1980_v54  ;;  %v1982_v40 = vmul.f32 %v1981_v17, %v1980_v54 }
 0x425   : > { %2420 = vmatmul.msk.f32.vlgmr.msra.gmra.mxu2 %vm785_vm4, %v1980_v54  ;;  %2423 = vmatmul.msk.f32.vlgmr.msra.gmra.mxu3 %vm785_vm4, %v1980_v54 }
 0x42c   : > { %2415 = vmatmul.msk.f32.gmra.mxu0 %vm785_vm4, %v1982_v40  ;;  %2418 = vmatmul.msk.f32.gmra.mxu1 %vm785_vm4, %v1982_v40 }
 0x42d   : > { %2421 = vmatmul.msk.f32.gmra.mxu2 %vm785_vm4, %v1982_v40  ;;  %2424 = vmatmul.msk.f32.gmra.mxu3 %vm785_vm4, %v1982_v40 }
 0x434   : > { %2426 = vmatmul.msk.f32.vlgmr.msrb.gmra.mxu0 %vm785_vm4, %v1980_v54  ;;  %2429 = vmatmul.msk.f32.vlgmr.msrb.gmra.mxu1 %vm785_vm4, %v1980_v54 }
 0x435   : > { %2432 = vmatmul.msk.f32.vlgmr.msrb.gmra.mxu2 %vm785_vm4, %v1980_v54  ;;  %2435 = vmatmul.msk.f32.vlgmr.msrb.gmra.mxu3 %vm785_vm4, %v1980_v54 }
 0x43c   : > { %2427 = vmatmul.msk.f32.gmra.mxu0 %vm785_vm4, %v1982_v40  ;;  %2430 = vmatmul.msk.f32.gmra.mxu1 %vm785_vm4, %v1982_v40 }
 0x43d   : > { %2433 = vmatmul.msk.f32.gmra.mxu2 %vm785_vm4, %v1982_v40  ;;  %2436 = vmatmul.msk.f32.gmra.mxu3 %vm785_vm4, %v1982_v40 }
 0x4a1   : > { %v2037_v60 = vpop.f32.mrf.mxu0  ;;  %v2060_v13 = vpop.f32.mrf.mxu1 }
 0x4a2   : > { %v2204_v59 = vmul.f32 %v2037_v60, %v4256_v4  ;;  %v2205_v53 = vmul.f32 %v2060_v13, %v4247_v33  ;;  %v2250_v13 = vld [vmem:[%s2781_s13 + $0x30] sm:$0xff] }
 0x4a8   : > { %v2083_v11 = vpop.f32.mrf.mxu2  ;;  %v2106_v55 = vpop.f32.mrf.mxu3 }
 0x4a9   : > { %v2040_v8 = vpop.f32.mrf.mxu0  ;;  %v2063_v14 = vpop.f32.mrf.mxu1  ;;  %v2206_v33 = vmul.f32 %v2083_v11, %v4241_v52  ;;  %v2207_v35 = vmul.f32 %v2106_v55, %v4243_v3 }
 0x4aa   : > { %v2212_v45 = vadd.f32 %v2204_v59, %v2040_v8  ;;  %v2213_v15 = vadd.f32 %v2205_v53, %v2063_v14 }
 0x4ac   : > { %vm2220_vm1 = vcmp.ge.f32.partialorder %v2212_v45, 0.0  ;;  %v2228_v43 = vmul.f32 0.2, %v2212_v45  ;;  %vm2221_vm12 = vcmp.ge.f32.partialorder %v2213_v15, 0.0  ;;  %v2229_v46 = vmul.f32 0.2, %v2213_v15 }
 0x4ae   : > { %v2236_v4 = vsel %vm2220_vm1, %v2212_v45, %v2228_v43  ;;  %v2237_v56 = vsel %vm2221_vm12, %v2213_v15, %v2229_v46 }
 0x4af   : > { %v2252_v24 = vadd.f32 %v2244_v7, %v2236_v4  ;;  %v2253_v10 = vadd.f32 %v2245_v58, %v2237_v56 }
 0x4b0   : > { %v2086_v19 = vpop.f32.mrf.mxu2  ;;  %v2109_v30 = vpop.f32.mrf.mxu3 }
 0x4b1   : > { %v2260_v26 = vmax.f32 %v2252_v24, 0.0  ;;  %v2261_v18 = vmax.f32 %v2253_v10, 0.0  ;;  %v2214_v21 = vadd.f32 %v2206_v33, %v2086_v19  ;;  %v2215_v28 = vadd.f32 %v2207_v35, %v2109_v30  ;;  %v2129_v48 = vpop.f32.mrf.mxu0  ;;  %v2152_v57 = vpop.f32.mrf.mxu1 }
 0x4b2   : > { %v2208_v50 = vmul.f32 %v2129_v48, %v4271_v0  ;;  %v2209_v6 = vmul.f32 %v2152_v57, %v4273_v1 }
 0x4b3   : > { %2268 = vst [vmem:[%s4316_s28] sm:$0xff] %v2260_v26  ;;  %vm2222_vm4 = vcmp.ge.f32.partialorder %v2214_v21, 0.0  ;;  %v2230_v52 = vmul.f32 0.2, %v2214_v21  ;;  %vm2223_vm13 = vcmp.ge.f32.partialorder %v2215_v28, 0.0  ;;  %v2231_v3 = vmul.f32 0.2, %v2215_v28 }
 0x4b4   : > { %2269 = vst [vmem:[%s4316_s28 + $0x8] sm:$0xff] %v2261_v18 }
 0x4b5   : > { %v2238_v63 = vsel %vm2222_vm4, %v2214_v21, %v2230_v52  ;;  %v2239_v41 = vsel %vm2223_vm13, %v2215_v28, %v2231_v3 }
 0x4b6   : > { %v2254_v12 = vadd.f32 %v2246_v29, %v2238_v63  ;;  %v2255_v34 = vadd.f32 %v2247_v32, %v2239_v41 }
 0x4b8   : > { %v2262_v61 = vmax.f32 %v2254_v12, 0.0  ;;  %v2263_v22 = vmax.f32 %v2255_v34, 0.0  ;;  %v2175_v36 = vpop.f32.mrf.mxu2  ;;  %v2198_v42 = vpop.f32.mrf.mxu3 }
 0x4b9   : > { %v2132_v9 = vpop.f32.mrf.mxu0  ;;  %v2155_v25 = vpop.f32.mrf.mxu1  ;;  %v2210_v1 = vmul.f32 %v2175_v36, %v4261_v31  ;;  %v2211_v27 = vmul.f32 %v2198_v42, %v4264_v5  ;;  %v2251_v5 = vld [vmem:[%s2781_s13 + $0x38] sm:$0xff] }
 0x4ba   : > { %2270 = vst [vmem:[%s4316_s28 + $0x10] sm:$0xff] %v2262_v61  ;;  %v2216_v49 = vadd.f32 %v2208_v50, %v2132_v9  ;;  %v2217_v20 = vadd.f32 %v2209_v6, %v2155_v25 }
 0x4bb   : > { %2271 = vst [vmem:[%s4316_s28 + $0x18] sm:$0xff] %v2263_v22 }
 0x4bc   : > { %vm2224_vm14 = vcmp.ge.f32.partialorder %v2216_v49, 0.0  ;;  %v2232_v51 = vmul.f32 0.2, %v2216_v49  ;;  %vm2225_vm15 = vcmp.ge.f32.partialorder %v2217_v20, 0.0  ;;  %v2233_v44 = vmul.f32 0.2, %v2217_v20 }
 0x4be   : > { %v2240_v39 = vsel %vm2224_vm14, %v2216_v49, %v2232_v51  ;;  %v2241_v0 = vsel %vm2225_vm15, %v2217_v20, %v2233_v44 }
 0x4bf   : > { %v2256_v16 = vadd.f32 %v2248_v37, %v2240_v39  ;;  %v2257_v62 = vadd.f32 %v2249_v38, %v2241_v0 }
 0x4c0   : > { %v2178_v2 = vpop.f32.mrf.mxu2  ;;  %v2201_v47 = vpop.f32.mrf.mxu3 }
 0x4c1   : > { %v2264_v23 = vmax.f32 %v2256_v16, 0.0  ;;  %v2265_v54 = vmax.f32 %v2257_v62, 0.0  ;;  %v2218_v17 = vadd.f32 %v2210_v1, %v2178_v2  ;;  %v2219_v40 = vadd.f32 %v2211_v27, %v2201_v47 }
 0x4c3   : > { %2272 = vst [vmem:[%s4316_s28 + $0x20] sm:$0xff] %v2264_v23  ;;  %vm2226_vm0 = vcmp.ge.f32.partialorder %v2218_v17, 0.0  ;;  %v2234_v60 = vmul.f32 0.2, %v2218_v17  ;;  %vm2227_vm2 = vcmp.ge.f32.partialorder %v2219_v40, 0.0 }
 0x4c4   : > { %2273 = vst [vmem:[%s4316_s28 + $0x28] sm:$0xff] %v2265_v54  ;;  %v2235_v31 = vmul.f32 0.2, %v2219_v40 }
 0x4c5   : > { %v2242_v59 = vsel %vm2226_vm0, %v2218_v17, %v2234_v60 }
 0x4c6   : > { %v2258_v53 = vadd.f32 %v2250_v13, %v2242_v59  ;;  %v2243_v11 = vsel %vm2227_vm2, %v2219_v40, %v2235_v31 }
 0x4c7   : > { %v2259_v55 = vadd.f32 %v2251_v5, %v2243_v11 }
 0x4c8   : > { %v2266_v8 = vmax.f32 %v2258_v53, 0.0 }
 0x4c9   : > { %v2267_v14 = vmax.f32 %v2259_v55, 0.0 }
 0x4ca   : > { %2274 = vst [vmem:[%s4316_s28 + $0x30] sm:$0xff] %v2266_v8 }
 0x4cb   : > { %2275 = vst [vmem:[%s4316_s28 + $0x38] sm:$0xff] %v2267_v14 }
 0x4cc   : > { %2649 = shalt.err (!%p2646_p3)
}
 0x4cd   : > { %2443 = dma.vmem_to_hbm [thread:$0]  (%p2767_p5), %s2291_s25, 1024, %s2293_s20, %s2277_s26  }
 0x4ce PF: > { %p2449_p4 = scmp.ge.s32.totalorder %s2684_s24, 2  ;;  %s2304_s14 = sand.u32 1, %s2672_s21  }
 0x4cf   : > { %s2305_s28 = scalar_lea.sflag [#allocation4], %s2304_s14 }
 0x4d0   : > { %p2446_p7 = pnand %p2449_p4, %p2771_p6 }
 0x4d2   : > { %p2447_p8 = pneg %p2446_p7 }
 0x4d4   : > { %2667 = dma.done.wait (%p2447_p8), %s2305_s28, 1024  }
 0x4d5   : > { %2669 = vsyncadd (%p2447_p8), %s2305_s28, 4294966272  ;;  %p16_p9 = scmp.ge.s32.totalorder %s2754_s27, 4   ;;  %s4377_s21 = smov %s2676_s22 }
 0x4d6   : > { %s4378_s22 = smov %s2680_s23  ;;  %s4379_s23 = smov %s2765_s30 }
 0x4d7   : > { %s4380_s24 = smov %s2754_s27  ;;  %18 = sbr.rel (!%p16_p9) target bundleno = 3 (0x3), region = 92 }
 0x4dc   :  { %2311 = vsyncpa [#allocation4], 1 }
 0x4dd   :  { %2313 = vsyncpa [#allocation4 + $0x1], 1 }

</bundles_post_ra>
